<compile_context>
chip_gen: v7x
topology: tpu7x:2x2x1
jax: 0.10.0
libtpu: 0.0.40
codegen_flags: <defaults>
</compile_context>

<pallas_src>
import functools

import jax
import jax.numpy as jnp
from jax import lax
from jax.experimental import pallas as pl
from jax.experimental.pallas import tpu as pltpu

BN_EPS = 1e-5
LANE = 128


def _round_up(x, m):
    return (x + m - 1) // m * m


def _pick_tile_h(h_out, w_out, cap_rows=1024):
    """Pick th | h_out with tile_m = th*w_out a multiple of 8 and <= cap_rows.

    Prefers >= 2 tiles per sample so the inner grid axis has pipeline depth and both
    v7x TensorCores get work even at tiny batch sizes.
    """
    best = None
    best_multi = None
    for th in range(1, h_out + 1):
        if h_out % th:
            continue
        tm = th * w_out
        if tm % 8 != 0 or tm > cap_rows:
            continue
        best = th
        if th < h_out:
            best_multi = th
    if best_multi is not None:
        return best_multi
    if best is not None:
        return best
    return h_out  # fallback: full-sample tile (block equals the full dim -> legal)


def _vmem_limit_bytes():
    """Generation-aware VMEM cap: stay well under 64 MiB physical on v7x-class chips,
    use the larger 128 MiB VMEM on v5e/v6e."""
    cap = None
    try:
        cap = getattr(pltpu.get_tpu_info(), "vmem_capacity_bytes", None)
    except Exception:
        cap = None
    if cap is not None and cap > 96 * 1024 * 1024:
        return 96 * 1024 * 1024  # v5e / v6e class: 128 MiB physical VMEM
    return 48 * 1024 * 1024      # v7x class (64 MiB physical) or unknown: be safe


# --------------------------------------------------------------------------- #
# Conv (implicit im2col, single lane-dense bf16 MXU dot) + per-tile BN stats   #
# --------------------------------------------------------------------------- #
def _conv_stats_kernel(x_ref, w_ref, y_ref, stat_ref, *,
                       kh, kw, stride, th, w_out, c_in, k, k_pad):
    # x_ref:    [1, Hp, Wp, Cin]       bf16  (resident across the inner grid axis)
    # w_ref:    [K_pad, Cout_pad]      bf16  (resident across the whole grid)
    # y_ref:    [1, tile_m, Cout_pad]  bf16  conv output tile (lane dense)
    # stat_ref: [1, 1, 2, Cout_pad]    f32   per-tile (sum, centered sum of squares)
    j = pl.program_id(1)
    tile_m = th * w_out
    row0 = j * th * stride  # first (padded) input row touched by this output tile

    # Implicit im2col: gather each tap window straight from the ref (no full-slab
    # value materialization) and pack all taps along the lane axis into one
    # K_pad-wide LHS, so the contraction runs as a single packed MXU matmul.
    # The packing is done in f32 (robust 32-bit lane relayout path) and cast to bf16
    # once, right before the dot.
    pieces = []
    for ky in range(kh):            # static unroll
        for kx in range(kw):
            if stride == 1:
                sl = x_ref[0, pl.ds(row0 + ky, th), pl.ds(kx, w_out), :]
            else:
                sl = x_ref[0, pl.ds(row0 + ky, th, stride),
                           pl.ds(kx, w_out, stride), :]
            # [th, w_out, Cin] -> [tile_m, Cin]: merges the two major dims only,
            # minor (lane) dim unchanged -> cheap reshape.
            pieces.append(sl.reshape(tile_m, c_in).astype(jnp.float32))
    if k_pad > k:
        pieces.append(jnp.zeros((tile_m, k_pad - k), jnp.float32))
    lhs = jnp.concatenate(pieces, axis=-1).astype(jnp.bfloat16)  # [tile_m, K_pad]

    acc = jnp.dot(lhs, w_ref[...], preferred_element_type=jnp.float32)
    y_ref[0] = acc.astype(y_ref.dtype)  # bf16 store: stats below stay in f32

    # Per-tile centered statistics (combined Chan-style in the wrapper).
    tsum = jnp.sum(acc, axis=0, keepdims=True)              # [1, Cout_pad]
    cen = acc - tsum * (1.0 / tile_m)
    tm2 = jnp.sum(cen * cen, axis=0, keepdims=True)         # [1, Cout_pad]
    stat_ref[0, 0] = jnp.concatenate([tsum, tm2], axis=0)   # [2, Cout_pad]


@functools.partial(jax.jit, static_argnames=("k_size", "stride", "padding"))
def conv_block_forward(x_nchw, weight, bias, gamma, beta, *, k_size, stride, padding):
    """Forward of conv_block. x_nchw: [N, Cin, H, W] -> [N, Cout, Hout, Wout]."""
    del bias  # per-channel constant shift cancels exactly under train-mode batch BN
    n, c_in, h, w = x_nchw.shape
    c_out = weight.shape[0]
    c_out_pad = _round_up(max(c_out, LANE), LANE)
    h_out = (h + 2 * padding - k_size) // stride + 1
    w_out = (w + 2 * padding - k_size) // stride + 1
    k = k_size * k_size * c_in
    k_pad = _round_up(max(k, LANE), LANE)

    th = _pick_tile_h(h_out, w_out)
    num_h_tiles = h_out // th
    tile_m = th * w_out
    m_total = n * h_out * w_out

    # NCHW -> NHWC, cast to bf16 BEFORE padding (halves staging traffic/footprint).
    x_nhwc = jnp.transpose(x_nchw, (0, 2, 3, 1)).astype(jnp.bfloat16)
    x_pad = jnp.pad(x_nhwc, ((0, 0), (padding, padding), (padding, padding), (0, 0)))
    hp, wp = h + 2 * padding, w + 2 * padding
    # TODO(synk): for very large images with tiny Cin, stage the input as
    # [N, Hp, Wp*Cin] so the resident block's lane dim is dense (cuts the lane-padded
    # VMEM/DMA footprint of the staged sample ~128/Cin x).

    # [Cout, Cin, kH, kW] -> rows ordered (ky, kx, c) to match the kernel's K packing,
    # zero-padded to [K_pad, Cout_pad], bf16 MXU feed.
    w_r = jnp.transpose(weight, (2, 3, 1, 0)).reshape(k, c_out)
    w_r = jnp.pad(w_r, ((0, k_pad - k), (0, c_out_pad - c_out))).astype(jnp.bfloat16)

    kern = functools.partial(_conv_stats_kernel, kh=k_size, kw=k_size, stride=stride,
                             th=th, w_out=w_out, c_in=c_in, k=k, k_pad=k_pad)

    flops = 2 * m_total * k_pad * c_out_pad
    bytes_accessed = (x_pad.size * 2 + w_r.size * 2
                      + m_total * c_out_pad * 2
                      + n * num_h_tiles * 2 * c_out_pad * 4)

    y3, stats = pl.pallas_call(
        kern,
        grid=(n, num_h_tiles),
        in_specs=[
            pl.BlockSpec((1, hp, wp, c_in), lambda i, j: (i, 0, 0, 0)),
            pl.BlockSpec((k_pad, c_out_pad), lambda i, j: (0, 0)),
        ],
        out_specs=(
            pl.BlockSpec((1, tile_m, c_out_pad), lambda i, j: (i, j, 0)),
            pl.BlockSpec((1, 1, 2, c_out_pad), lambda i, j: (i, j, 0, 0)),
        ),
        out_shape=(
            jax.ShapeDtypeStruct((n, h_out * w_out, c_out_pad), jnp.bfloat16),
            jax.ShapeDtypeStruct((n, num_h_tiles, 2, c_out_pad), jnp.float32),
        ),
        compiler_params=pltpu.CompilerParams(
            dimension_semantics=("parallel", "parallel"),
            vmem_limit_bytes=_vmem_limit_bytes()),
        cost_estimate=pl.CostEstimate(flops=flops, transcendentals=0,
                                      bytes_accessed=bytes_accessed),
    )(x_pad, w_r)

    # Chan-style combine of per-tile (sum, centered M2) -> global mean / biased var.
    tsum = stats[:, :, 0, :c_out]                     # [n, tiles, c_out] f32
    tm2 = stats[:, :, 1, :c_out]
    mean = jnp.sum(tsum, axis=(0, 1)) / m_total
    tile_mean = tsum / tile_m
    m2 = jnp.sum(tm2, axis=(0, 1)) + tile_m * jnp.sum((tile_mean - mean) ** 2,
                                                      axis=(0, 1))
    var = jnp.maximum(m2 / m_total, 0.0)              # biased (train-mode BN)

    scale = gamma.astype(jnp.float32) * lax.rsqrt(var + BN_EPS)
    shift = beta.astype(jnp.float32) - mean * scale

    # Normalize + affine + ReLU epilogue is left to XLA: it fuses into the channel
    # slice + NCHW transpose, so the bf16 intermediate is read from HBM exactly once.
    y = y3[:, :, :c_out].astype(jnp.float32)          # [n, h_out*w_out, c_out]
    out = jnp.maximum(y * scale[None, None, :] + shift[None, None, :], 0.0)
    out = out.reshape(n, h_out, w_out, c_out)
    return jnp.transpose(out, (0, 3, 1, 2))


# --------------------------------------------------------------------------- #
# Pure-JAX reference (conv + train-mode BN + ReLU) for correctness checks      #
# --------------------------------------------------------------------------- #
def _reference(x_nchw, weight, bias, gamma, beta, *, stride, padding):
    y = lax.conv_general_dilated(
        x_nchw.astype(jnp.float32), weight.astype(jnp.float32),
        window_strides=(stride, stride),
        padding=[(padding, padding), (padding, padding)],
        dimension_numbers=("NCHW", "OIHW", "NCHW"),
    ) + bias.reshape(1, -1, 1, 1).astype(jnp.float32)
    mean = jnp.mean(y, axis=(0, 2, 3), keepdims=True)
    var = jnp.mean((y - mean) ** 2, axis=(0, 2, 3), keepdims=True)
    y = (y - mean) * lax.rsqrt(var + BN_EPS)
    y = y * gamma.reshape(1, -1, 1, 1) + beta.reshape(1, -1, 1, 1)
    return jnp.maximum(y, 0.0)


if __name__ == "__main__":
    # conv_block(in_channels=4, out_channels=8, k_size=3, stride=1, padding=1)
    N, C_IN, H, W = 2, 4, 16, 16
    C_OUT, KSZ, STRIDE, PAD = 8, 3, 1, 1

    key = jax.random.PRNGKey(0)
    k_x, k_w, k_b, k_g, k_be = jax.random.split(key, 5)

    x = jax.random.normal(k_x, (N, C_IN, H, W), dtype=jnp.float32)
    weight = jax.random.normal(k_w, (C_OUT, C_IN, KSZ, KSZ), dtype=jnp.float32) * 0.1
    bias = jax.random.normal(k_b, (C_OUT,), dtype=jnp.float32) * 0.1
    gamma = 1.0 + 0.1 * jax.random.normal(k_g, (C_OUT,), dtype=jnp.float32)
    beta = 0.1 * jax.random.normal(k_be, (C_OUT,), dtype=jnp.float32)

    out = conv_block_forward(x, weight, bias, gamma, beta,
                             k_size=KSZ, stride=STRIDE, padding=PAD)
    out = jax.block_until_ready(out)
    assert out.shape == (N, C_OUT, H, W), out.shape

    # Primary check: reference fed the same bf16-rounded operands the kernel feeds
    # the MXU (tolerance also covers the bf16 storage of the conv intermediate).
    x_r = x.astype(jnp.bfloat16).astype(jnp.float32)
    w_rr = weight.astype(jnp.bfloat16).astype(jnp.float32)
    ref_bf16 = _reference(x_r, w_rr, bias, gamma, beta, stride=STRIDE, padding=PAD)
    assert jnp.allclose(out, ref_bf16, atol=3e-2, rtol=3e-2), \
        "mismatch vs bf16-rounded reference"

    # Looser sanity check vs full-f32 math (covers bf16 input/weight rounding).
    ref_f32 = _reference(x, weight, bias, gamma, beta, stride=STRIDE, padding=PAD)
    assert jnp.allclose(out, ref_f32, atol=7e-2, rtol=7e-2), \
        "mismatch vs f32 reference"

    print("KERNEL_OK")
</pallas_src>

<mosaic_0001>
module attributes {stable_mosaic.version = 11 : i64} {
  func.func @_conv_stats_kernel(%arg0: i32, %arg1: i32, %arg2: memref<1x18x18x4xbf16, #tpu.memory_space<vmem>>, %arg3: memref<128x128xbf16, #tpu.memory_space<vmem>>, %arg4: memref<1x128x128xbf16, #tpu.memory_space<vmem>>, %arg5: memref<1x1x2x128xf32, #tpu.memory_space<vmem>>) attributes {dimension_semantics = [#tpu.dimension_semantics<parallel>, #tpu.dimension_semantics<parallel>], iteration_bounds = array<i64: 2, 2>, scalar_prefetch = 0 : i64, scratch_operands = 0 : i64, tpu.core_type = #tpu.core_type<tc>, window_params = [{transform_indices = @transform_0, window_bounds = array<i64: 1, 18, 18, 4>}, {pipeline_mode = #tpu.pipeline_mode<synchronous>, transform_indices = @transform_1, window_bounds = array<i64: 128, 128>}, {transform_indices = @transform_2, window_bounds = array<i64: 1, 128, 128>}, {transform_indices = @transform_3, window_bounds = array<i64: 1, 1, 2, 128>}]} {
    %c8_i32 = arith.constant 8 : i32
    %0 = arith.muli %arg1, %c8_i32 : i32
    %c1_i32 = arith.constant 1 : i32
    %1 = arith.muli %0, %c1_i32 : i32
    %c0_i32 = arith.constant 0 : i32
    %2 = arith.addi %1, %c0_i32 : i32
    %c0 = arith.constant 0 : index
    %3 = arith.index_cast %2 : i32 to index
    %c0_0 = arith.constant 0 : index
    %c0_1 = arith.constant 0 : index
    %4 = vector.load %arg2[%c0, %3, %c0_0, %c0_1] : memref<1x18x18x4xbf16, #tpu.memory_space<vmem>>, vector<1x8x16x4xbf16>
    %5 = vector.shape_cast %4 : vector<1x8x16x4xbf16> to vector<8x16x4xbf16>
    %6 = vector.shape_cast %5 : vector<8x16x4xbf16> to vector<128x4xbf16>
    %7 = arith.extf %6 : vector<128x4xbf16> to vector<128x4xf32>
    %c0_i32_2 = arith.constant 0 : i32
    %8 = arith.addi %1, %c0_i32_2 : i32
    %c0_3 = arith.constant 0 : index
    %9 = arith.index_cast %8 : i32 to index
    %c1 = arith.constant 1 : index
    %c0_4 = arith.constant 0 : index
    %10 = vector.load %arg2[%c0_3, %9, %c1, %c0_4] : memref<1x18x18x4xbf16, #tpu.memory_space<vmem>>, vector<1x8x16x4xbf16>
    %11 = vector.shape_cast %10 : vector<1x8x16x4xbf16> to vector<8x16x4xbf16>
    %12 = vector.shape_cast %11 : vector<8x16x4xbf16> to vector<128x4xbf16>
    %13 = arith.extf %12 : vector<128x4xbf16> to vector<128x4xf32>
    %c0_i32_5 = arith.constant 0 : i32
    %14 = arith.addi %1, %c0_i32_5 : i32
    %c0_6 = arith.constant 0 : index
    %15 = arith.index_cast %14 : i32 to index
    %c2 = arith.constant 2 : index
    %c0_7 = arith.constant 0 : index
    %16 = vector.load %arg2[%c0_6, %15, %c2, %c0_7] : memref<1x18x18x4xbf16, #tpu.memory_space<vmem>>, vector<1x8x16x4xbf16>
    %17 = vector.shape_cast %16 : vector<1x8x16x4xbf16> to vector<8x16x4xbf16>
    %18 = vector.shape_cast %17 : vector<8x16x4xbf16> to vector<128x4xbf16>
    %19 = arith.extf %18 : vector<128x4xbf16> to vector<128x4xf32>
    %c1_i32_8 = arith.constant 1 : i32
    %20 = arith.addi %1, %c1_i32_8 : i32
    %c0_9 = arith.constant 0 : index
    %21 = arith.index_cast %20 : i32 to index
    %c0_10 = arith.constant 0 : index
    %c0_11 = arith.constant 0 : index
    %22 = vector.load %arg2[%c0_9, %21, %c0_10, %c0_11] : memref<1x18x18x4xbf16, #tpu.memory_space<vmem>>, vector<1x8x16x4xbf16>
    %23 = vector.shape_cast %22 : vector<1x8x16x4xbf16> to vector<8x16x4xbf16>
    %24 = vector.shape_cast %23 : vector<8x16x4xbf16> to vector<128x4xbf16>
    %25 = arith.extf %24 : vector<128x4xbf16> to vector<128x4xf32>
    %c1_i32_12 = arith.constant 1 : i32
    %26 = arith.addi %1, %c1_i32_12 : i32
    %c0_13 = arith.constant 0 : index
    %27 = arith.index_cast %26 : i32 to index
    %c1_14 = arith.constant 1 : index
    %c0_15 = arith.constant 0 : index
    %28 = vector.load %arg2[%c0_13, %27, %c1_14, %c0_15] : memref<1x18x18x4xbf16, #tpu.memory_space<vmem>>, vector<1x8x16x4xbf16>
    %29 = vector.shape_cast %28 : vector<1x8x16x4xbf16> to vector<8x16x4xbf16>
    %30 = vector.shape_cast %29 : vector<8x16x4xbf16> to vector<128x4xbf16>
    %31 = arith.extf %30 : vector<128x4xbf16> to vector<128x4xf32>
    %c1_i32_16 = arith.constant 1 : i32
    %32 = arith.addi %1, %c1_i32_16 : i32
    %c0_17 = arith.constant 0 : index
    %33 = arith.index_cast %32 : i32 to index
    %c2_18 = arith.constant 2 : index
    %c0_19 = arith.constant 0 : index
    %34 = vector.load %arg2[%c0_17, %33, %c2_18, %c0_19] : memref<1x18x18x4xbf16, #tpu.memory_space<vmem>>, vector<1x8x16x4xbf16>
    %35 = vector.shape_cast %34 : vector<1x8x16x4xbf16> to vector<8x16x4xbf16>
    %36 = vector.shape_cast %35 : vector<8x16x4xbf16> to vector<128x4xbf16>
    %37 = arith.extf %36 : vector<128x4xbf16> to vector<128x4xf32>
    %c2_i32 = arith.constant 2 : i32
    %38 = arith.addi %1, %c2_i32 : i32
    %c0_20 = arith.constant 0 : index
    %39 = arith.index_cast %38 : i32 to index
    %c0_21 = arith.constant 0 : index
    %c0_22 = arith.constant 0 : index
    %40 = vector.load %arg2[%c0_20, %39, %c0_21, %c0_22] : memref<1x18x18x4xbf16, #tpu.memory_space<vmem>>, vector<1x8x16x4xbf16>
    %41 = vector.shape_cast %40 : vector<1x8x16x4xbf16> to vector<8x16x4xbf16>
    %42 = vector.shape_cast %41 : vector<8x16x4xbf16> to vector<128x4xbf16>
    %43 = arith.extf %42 : vector<128x4xbf16> to vector<128x4xf32>
    %c2_i32_23 = arith.constant 2 : i32
    %44 = arith.addi %1, %c2_i32_23 : i32
    %c0_24 = arith.constant 0 : index
    %45 = arith.index_cast %44 : i32 to index
    %c1_25 = arith.constant 1 : index
    %c0_26 = arith.constant 0 : index
    %46 = vector.load %arg2[%c0_24, %45, %c1_25, %c0_26] : memref<1x18x18x4xbf16, #tpu.memory_space<vmem>>, vector<1x8x16x4xbf16>
    %47 = vector.shape_cast %46 : vector<1x8x16x4xbf16> to vector<8x16x4xbf16>
    %48 = vector.shape_cast %47 : vector<8x16x4xbf16> to vector<128x4xbf16>
    %49 = arith.extf %48 : vector<128x4xbf16> to vector<128x4xf32>
    %c2_i32_27 = arith.constant 2 : i32
    %50 = arith.addi %1, %c2_i32_27 : i32
    %c0_28 = arith.constant 0 : index
    %51 = arith.index_cast %50 : i32 to index
    %c2_29 = arith.constant 2 : index
    %c0_30 = arith.constant 0 : index
    %52 = vector.load %arg2[%c0_28, %51, %c2_29, %c0_30] : memref<1x18x18x4xbf16, #tpu.memory_space<vmem>>, vector<1x8x16x4xbf16>
    %53 = vector.shape_cast %52 : vector<1x8x16x4xbf16> to vector<8x16x4xbf16>
    %54 = vector.shape_cast %53 : vector<8x16x4xbf16> to vector<128x4xbf16>
    %55 = arith.extf %54 : vector<128x4xbf16> to vector<128x4xf32>
    %cst = arith.constant 0.000000e+00 : f32
    %56 = vector.broadcast %cst : f32 to vector<128x92xf32>
    %57 = tpu.concatenate %7, %13, %19, %25, %31, %37, %43, %49, %55, %56 in 1 : vector<128x4xf32>, vector<128x4xf32>, vector<128x4xf32>, vector<128x4xf32>, vector<128x4xf32>, vector<128x4xf32>, vector<128x4xf32>, vector<128x4xf32>, vector<128x4xf32>, vector<128x92xf32> -> vector<128x128xf32>
    %58 = arith.truncf %57 : vector<128x128xf32> to vector<128x128xbf16>
    %c0_31 = arith.constant 0 : index
    %c0_32 = arith.constant 0 : index
    %59 = vector.load %arg3[%c0_31, %c0_32] : memref<128x128xbf16, #tpu.memory_space<vmem>>, vector<128x128xbf16>
    %cst_33 = arith.constant dense<0.000000e+00> : vector<128x128xf32>
    %60 = tpu.matmul %58, %59, %cst_33 {dimension_numbers = #tpu.dot_dimension_numbers<[1], [0], [0], [1], [0, 0, 1, 1], [], []>} : vector<128x128xbf16>, vector<128x128xbf16>, vector<128x128xf32> -> vector<128x128xf32>
    %61 = arith.truncf %60 : vector<128x128xf32> to vector<128x128xbf16>
    %c0_34 = arith.constant 0 : index
    %c0_35 = arith.constant 0 : index
    %c0_36 = arith.constant 0 : index
    %62 = vector.load %arg4[%c0_34, %c0_35, %c0_36] : memref<1x128x128xbf16, #tpu.memory_space<vmem>>, vector<1x128x128xbf16>
    %63 = vector.shape_cast %62 : vector<1x128x128xbf16> to vector<128x128xbf16>
    %64 = vector.shape_cast %61 : vector<128x128xbf16> to vector<1x128x128xbf16>
    tpu.vector_store %arg4[%c0_34, %c0_35, %c0_36], %64 {strides = array<i32>} : memref<1x128x128xbf16, #tpu.memory_space<vmem>>, vector<1x128x128xbf16>,
    %cst_37 = arith.constant dense<0.000000e+00> : vector<128xf32>
    %65 = vector.multi_reduction <add>, %60, %cst_37 [0] : vector<128x128xf32> to vector<128xf32>
    %66 = vector.shape_cast %65 : vector<128xf32> to vector<1x128xf32>
    %cst_38 = arith.constant 7.812500e-03 : f32
    %67 = vector.broadcast %cst_38 : f32 to vector<1x128xf32>
    %68 = arith.mulf %66, %67 : vector<1x128xf32>
    %69 = vector.broadcast %68 : vector<1x128xf32> to vector<128x128xf32>
    %70 = arith.subf %60, %69 : vector<128x128xf32>
    %71 = arith.mulf %70, %70 : vector<128x128xf32>
    %cst_39 = arith.constant dense<0.000000e+00> : vector<128xf32>
    %72 = vector.multi_reduction <add>, %71, %cst_39 [0] : vector<128x128xf32> to vector<128xf32>
    %73 = vector.shape_cast %72 : vector<128xf32> to vector<1x128xf32>
    %74 = tpu.concatenate %66, %73 in 0 : vector<1x128xf32>, vector<1x128xf32> -> vector<2x128xf32>
    %c0_40 = arith.constant 0 : index
    %c0_41 = arith.constant 0 : index
    %c0_42 = arith.constant 0 : index
    %c0_43 = arith.constant 0 : index
    %75 = vector.load %arg5[%c0_40, %c0_41, %c0_42, %c0_43] : memref<1x1x2x128xf32, #tpu.memory_space<vmem>>, vector<1x1x2x128xf32>
    %76 = vector.shape_cast %75 : vector<1x1x2x128xf32> to vector<2x128xf32>
    %77 = vector.shape_cast %74 : vector<2x128xf32> to vector<1x1x2x128xf32>
    tpu.vector_store %arg5[%c0_40, %c0_41, %c0_42, %c0_43], %77 {strides = array<i32>} : memref<1x1x2x128xf32, #tpu.memory_space<vmem>>, vector<1x1x2x128xf32>,
    return
  }
  func.func @transform_0(%arg0: i32, %arg1: i32) -> (i32, i32, i32, i32) {
    %c0_i32 = arith.constant 0 : i32
    %c0_i32_0 = arith.constant 0 : i32
    %c0_i32_1 = arith.constant 0 : i32
    %c0_i32_2 = arith.constant 0 : i32
    return %arg0, %c0_i32, %c0_i32_0, %c0_i32_1 : i32, i32, i32, i32
  }
  func.func @transform_1(%arg0: i32, %arg1: i32) -> (i32, i32) {
    %c0_i32 = arith.constant 0 : i32
    %c0_i32_0 = arith.constant 0 : i32
    %c0_i32_1 = arith.constant 0 : i32
    return %c0_i32, %c0_i32_0 : i32, i32
  }
  func.func @transform_2(%arg0: i32, %arg1: i32) -> (i32, i32, i32) {
    %c0_i32 = arith.constant 0 : i32
    %c0_i32_0 = arith.constant 0 : i32
    return %arg0, %arg1, %c0_i32 : i32, i32, i32
  }
  func.func @transform_3(%arg0: i32, %arg1: i32) -> (i32, i32, i32, i32) {
    %c0_i32 = arith.constant 0 : i32
    %c0_i32_0 = arith.constant 0 : i32
    %c0_i32_1 = arith.constant 0 : i32
    return %arg0, %arg1, %c0_i32, %c0_i32_0 : i32, i32, i32, i32
  }
}

</mosaic_0001>

<bundles_post_ra>
// kernel: conv_block_forward.1
= control target key start
LH: loop header
LB: loop body
LE: loop exit
PB: predicated region body
PF: predicated region fallthrough
CT: control target
= control target key end

     0   :  { %s3263_s12 = smov 0   ;;  %s3265_s13 = smov 0   ;;  %s4249_s0 = inlined_call_operand.vmem [shape: bf16[2,18,18,4], index: 0, kind: input, shape index: {}]   ;;  %s4250_s1 = inlined_call_operand.vmem [shape: bf16[128,128], index: 1, kind: input, shape index: {}]   ;;  %s4251_s2 = inlined_call_operand.vmem [shape: bf16[2,256,128], index: 2, kind: output, shape index: {0}]   ;;  %s4252_s3 = inlined_call_operand.vmem [shape: f32[2,2,2,128], index: 3, kind: output, shape index: {1}]  }
   0x1   :  { %s3267_s14 = smov 0   ;;  %s3269_s15 = smov 0  }
   0x2   :  { %s3271_s16 = smov 0  }
   0x3 LB: > { %s23_s17 = sadd.s32 1, %s3225_s14  ;;  %s26_s18 = sadd.s32 1, %s3229_s15  ;;  %s3233_s16 = sphi %s3271_s16, %s14_s16   ;;  %s3229_s15 = sphi %s3269_s15, %s4262_s15   ;;  %s3225_s14 = sphi %s3267_s14, %s4261_s14   ;;  %s3221_s13 = sphi %s3265_s13, %s4260_s13   ;;  %s3217_s12 = sphi %s3263_s12, %s4259_s12  }
   0x4   : > { %p24_p0 = scmp.ge.s32.totalorder %s23_s17, 2  ;;  %p2523_p1 = scmp.ge.s32.totalorder %s3233_s16, 1 }
   0x5   : > { %p156_p2 = scmp.lt.s32.totalorder %s3233_s16, 5 }
   0x6   : > { %s4264_s17 = smov (%p24_p0, %s23_s17), 0  ;;  %s4266_s18 = smov (!%p24_p0, %s26_s18), %s3229_s15 }
   0x7   : > { %p157_p3 = pnand %p2523_p1, %p156_p2  ;;  %p28_p4 = scmp.ge.s32.totalorder %s4266_s18, 2 }
   0x8   : > { %p192_p5 = scmp.lt.s32.totalorder (!%p157_p3), %s3221_s13, 1  ;;  %s2675_s19 = smul.u32 (!%p157_p3), 96, %s3217_s12  ;;  %vm519_vm0 = vcmask (!%p157_p3), 1042432   ;;  %vm520_vm1 = vcmask (!%p157_p3), 1046532   ;;  %vm260_vm3 = vsmask.f32 (!%p157_p3), 3328 }
   0x9   : > { %s4268_s18 = smov (%p28_p4, %s4266_s18), 0  ;;  %160 = sbr.rel (%p157_p3) target bundleno = 614 (0x266), region = 28 }
   0xa   : > { %s3235_s25 = smov (!%p157_p3), 12   ;;  %vm3364_vm2 = vmor (!%p157_p3), %vm519_vm0, %vm520_vm1  ;;  %s3236_s26 = smov (!%p157_p3), 24   ;;  %vm261_vm4 = vsmask.f32 (!%p157_p3), 7440  ;;  %vm1898_vm6 = vcmask (!%p157_p3), 31744   ;;  %vm1915_vm7 = vcmask (!%p157_p3), 64512  }
   0xb   : > { %s3237_s27 = smov (!%p157_p3), 20   ;;  %s3238_s28 = smov (!%p157_p3), 8   ;;  %vm3408_vm5 = vmor (!%p157_p3), %vm260_vm3, %vm261_vm4  ;;  %vm1932_vm8 = vcmask (!%p157_p3), 97280   ;;  %vm1949_vm9 = vcmask (!%p157_p3), 130048   ;;  %vm1966_vm10 = vcmask (!%p157_p3), 162816   ;;  %vm1983_vm11 = vcmask (!%p157_p3), 195584  }
   0xc   : > { %s3239_s29 = smov (!%p157_p3), 4   ;;  %s3240_s30 = smov (!%p157_p3), 16   ;;  %vm2000_vm12 = vcmask (!%p157_p3), 228352   ;;  %vm2017_vm13 = vcmask (!%p157_p3), 261120   ;;  %vm2034_vm14 = vcmask (!%p157_p3), 293888   ;;  %vm2375_vm0 = vcmask (!%p157_p3), 1040384  }
   0xd   : > { %s3241_s4 = smov (!%p157_p3), 28   ;;  %s3242_s7 = smov (!%p157_p3), 32   ;;  %vm4042_vm15 = vmpackc.low (!%p157_p3), %vm2034_vm14, %vm2034_vm14 }
   0xe   : > { %p209_p7 = scmp.lt.s32.totalorder (!%p157_p3), %s3217_s12, 1 }
  0x10   : > { %s4270_s13 = smov (!%p192_p5, %s3221_s13), 1 }
  0x11   : > { %s2803_s20 = smul.u32 216, %s4270_s13 }
  0x13   : > { %s196_s23 = scalar_lea.vmem %s4249_s0, %s2803_s20 }
  0x14   : > { %s3302_s24 = scalar_lea.vmem %s196_s23, %s2675_s19 }
  0x15   : > { %v2545_v0 = vld [vmem:[%s3302_s24 + $0x18] sm:$0xf]  ;;  %v3306_v1 = vld [vmem:[%s3302_s24 + $0x1c] sm:$0xf]  ;;  %v2543_v2 = vld [vmem:[%s3302_s24 + $0xc] sm:$0xf] }
  0x16   : > { %v632_v3 = vunpack.c.l.bf16 %v2545_v0  ;;  %v633_v4 = vunpack.c.l.bf16 %v3306_v1  ;;  %v679_v5 = vshrl.u32 %v2545_v0, 16  ;;  %v682_v6 = vshll.u32 %v2545_v0, 16  ;;  %v3311_v7 = vld [vmem:[%s3302_s24 + $0x10] sm:$0xf]  ;;  %v2587_v8 = vld [vmem:[%s3302_s24 + $0x24] sm:$0xf] }
  0x17   : > { %v692_v9 = vshrl.u32 %v3306_v1, 16  ;;  %v630_v10 = vunpack.c.l.bf16 %v2543_v2  ;;  %v631_v11 = vunpack.c.l.bf16 %v3311_v7  ;;  %v655_v12 = vshrl.u32 %v2543_v2, 16  ;;  %v3317_v13 = vld [vmem:[%s3302_s24 + $0x28] sm:$0xf]  ;;  %v2585_v14 = vld [vmem:[%s3302_s24 + $0x18] sm:$0xf] }
  0x18   : > { %v3320_v15 = vrot.slane %v679_v5, 4  ;;  %v3322_v16 = vrot.slane %v682_v6, 5  ;;  %v2857_v17 = vpack.i.bf16 %v633_v4, %v632_v3  ;;  %v658_v18 = vshll.u32 %v2543_v2, 16  ;;  %v3325_v19 = vld [vmem:[%s3302_s24 + $0x1c] sm:$0xf] }
  0x19   : > { %v3327_v20 = vrot.slane %v692_v9, 4  ;;  %v3329_v21 = vrot.slane %v655_v12, 4  ;;  %v668_v22 = vshrl.u32 %v3311_v7, 16  ;;  %v2852_v23 = vpack.i.bf16 %v631_v11, %v630_v10  ;;  %v3333_v24 = vld [vmem:[%s3302_s24 + $0x14] sm:$0x1] }
  0x1a   : > { %v685_v25 = vor.u32 %v3322_v16, %v3320_v15  ;;  %2858 = vrot.lane.b32.xlu1 %v2857_v17, %s3235_s25  ;;  %v3338_v26 = vrot.slane %v658_v18, 5  ;;  %v1020_v27 = vunpack.c.l.bf16 %v2587_v8  ;;  %v1021_v28 = vunpack.c.l.bf16 %v3317_v13  ;;  %v2567_v29 = vld [vmem:[%s3302_s24 + $0xc] sm:$0xe]  ;;  %v3343_v30 = vld [vmem:[%s3302_s24 + $0x4] sm:$0xf] }
  0x1b   : > { %v3345_v31 = vrot.slane %v668_v22, 4  ;;  %2853 = vrot.lane.b32.xlu0 %v2852_v23, %s3235_s25  ;;  %v1067_v32 = vshrl.u32 %v2587_v8, 16  ;;  %v1070_v33 = vshll.u32 %v2587_v8, 16  ;;  %v1018_v34 = vunpack.c.l.bf16 %v2585_v14  ;;  %v3349_v35 = vld [vmem:[%s3302_s24 + $0x8] sm:$0x1] }
  0x1c   : > { %v661_v36 = vor.u32 %v3338_v26, %v3329_v21  ;;  %v2867_v37 = vpack.i.bf16 %v1021_v28, %v1020_v27  ;;  %v1019_v38 = vunpack.c.l.bf16 %v3325_v19  ;;  %v1043_v39 = vshrl.u32 %v2585_v14, 16  ;;  %v487_v40 = vld [vmem:[%s3302_s24] sm:$0xe]  ;;  %v3356_v41 = vld [vmem:[%s3302_s24 + $0x10] sm:$0xf] }
  0x1d   : > { %v3358_v42 = vrot.slane %v1067_v32, 4  ;;  %v3360_v43 = vrot.slane %v1070_v33, 5  ;;  %v1046_v44 = vshll.u32 %v2585_v14, 16  ;;  %v2575_v46 = vrot.slane %v2567_v29, 9  ;;  %v3369_v47 = vld [vmem:[%s3302_s24 + $0x14] sm:$0x1] }
  0x1e   : > { %2868 = vrot.lane.b32.xlu1 %v2867_v37, %s3236_s26  ;;  %v3372_v48 = vrot.slane %v1043_v39, 4  ;;  %v2862_v49 = vpack.i.bf16 %v1019_v38, %v1018_v34  ;;  %v912_v50 = vrot.slane %v3311_v7, 5  ;;  %v915_v51 = vrot.slane %v3333_v24, 5  ;;  %v488_v52 = vld [vmem:[%s3302_s24 + $0xc] sm:$0xe] }
  0x1f   : > { %v3377_v53 = vrot.slane %v1046_v44, 5  ;;  %v2533_v54 = vrot.slane %v487_v40, 9  ;;  %v524_v55 = vrot.slane %v3343_v30, 5  ;;  %v527_v56 = vrot.slane %v3349_v35, 5  ;;  %v220_v61 = vld [vmem:[%s3302_s24] sm:$0xf] }
  0x20   : > { %2863 = vrot.lane.b32.xlu0 %v2862_v49, %s3236_s26  ;;  %v913_v57 = vsel %vm3364_vm2, %v2575_v46, %v912_v50  ;;  %v914_v58 = vrot.slane %v912_v50, 4  ;;  %v2534_v59 = vrot.slane %v488_v52, 9  ;;  %v531_v60 = vrot.slane %v3356_v41, 5  ;;  %v2568_v22 = vld [vmem:[%s3302_s24 + $0x18] sm:$0xe] }
  0x21   : > { %v982_v62 = vunpack.c.l.bf16 %v913_v57  ;;  %v525_v63 = vsel %vm3364_vm2, %v2533_v54, %v524_v55  ;;  %v526_v0 = vrot.slane %v524_v55, 4  ;;  %v534_v2 = vrot.slane %v3369_v47, 5  ;;  %v2560_v32 = vld [vmem:[%s3302_s24 + $0x20] sm:$0x1]  ;;  %v222_v33 = vld [vmem:[%s3302_s24 + $0xc] sm:$0xf] }
  0x22   : > { %v916_v3 = vsel %vm3364_vm2, %v914_v58, %v915_v51  ;;  %v594_v4 = vunpack.c.l.bf16 %v525_v63  ;;  %v532_v5 = vsel %vm3364_vm2, %v2534_v59, %v531_v60  ;;  %v533_v6 = vrot.slane %v531_v60, 4 }
  0x23   : > { %v983_v8 = vunpack.c.l.bf16 %v916_v3  ;;  %v528_v9 = vsel %vm3364_vm2, %v526_v0, %v527_v56  ;;  %v596_v10 = vunpack.c.l.bf16 %v532_v5  ;;  %v264_v11 = vshrl.u32 %v220_v61, 16 }
  0x24   : > { %v595_v12 = vunpack.c.l.bf16 %v528_v9  ;;  %v535_v14 = vsel %vm3364_vm2, %v533_v6, %v534_v2  ;;  %v267_v17 = vshll.u32 %v220_v61, 16  ;;  %v273_v18 = vshll.u32 %v3343_v30, 16 }
  0x25   : > { %v2882_v23 = vpack.i.bf16 %v983_v8, %v982_v62  ;;  %v597_v27 = vunpack.c.l.bf16 %v535_v14  ;;  %v266_v28 = vrot.slane %v264_v11, 4  ;;  %v277_v29 = vshrl.u32 %v3343_v30, 16 }
  0x26   : > { %v2872_v34 = vpack.i.bf16 %v595_v12, %v594_v4  ;;  %v269_v37 = vrot.slane %v267_v17, 5  ;;  %v275_v38 = vrot.slane %v273_v18, 5  ;;  %v283_v39 = vshll.u32 %v3349_v35, 16 }
  0x27   : > { %2883 = vrot.lane.b32.xlu0 %v2882_v23, %s3237_s27  ;;  %v2877_v40 = vpack.i.bf16 %v597_v27, %v596_v10  ;;  %v279_v44 = vrot.slane %v277_v29, 4  ;;  %v2576_v46 = vrot.slane %v2568_v22, 9  ;;  %v919_v49 = vrot.slane %v3306_v1, 5 }
  0x28   : > { %2873 = vrot.lane.b32.xlu1 %v2872_v34, %s3238_s28  ;;  %v270_v50 = vor.u32 %v269_v37, %v266_v28  ;;  %v285_v30 = vrot.slane %v283_v39, 5  ;;  %v922_v51 = vrot.slane %v2560_v32, 5  ;;  %v288_v52 = vshrl.u32 %v222_v33, 16 }
  0x29   : > { %v280_v35 = vor.u32 %v279_v44, %v275_v38  ;;  %v920_v55 = vsel %vm3364_vm2, %v2576_v46, %v919_v49  ;;  %v921_v56 = vrot.slane %v919_v49, 4  ;;  %v291_v57 = vshll.u32 %v222_v33, 16 }
  0x2a   : > { %v271_v58 = vrot.slane %v270_v50, 4  ;;  %v984_v59 = vunpack.c.l.bf16 %v920_v55  ;;  %v290_v60 = vrot.slane %v288_v52, 4  ;;  %v297_v61 = vshll.u32 %v3356_v41, 16 }
  0x2b   : > { %v281_v62 = vrot.slane %v280_v35, 4  ;;  %v923_v63 = vsel %vm3364_vm2, %v921_v56, %v922_v51  ;;  %v293_v0 = vrot.slane %v291_v57, 5  ;;  %v301_v2 = vshrl.u32 %v3356_v41, 16  ;;  %v3458_v56 = vld [vmem:[%s3302_s24 + $0x20] sm:$0x1] }
  0x2c   : > { %2878 = vrot.lane.b32.xlu1 %v2877_v40, %s3238_s28  ;;  %v276_v3 = vsel %vm3408_vm5, %v271_v58, %v275_v38  ;;  %v985_v4 = vunpack.c.l.bf16 %v923_v63  ;;  %v299_v5 = vrot.slane %v297_v61, 5  ;;  %v307_v6 = vshll.u32 %v3369_v47, 16 }
  0x2d   : > { %v286_v8 = vsel %vm3408_vm5, %v281_v62, %v285_v30  ;;  %v471_v9 = vunpack.c.l.bf16 %v276_v3  ;;  %v294_v10 = vor.u32 %v293_v0, %v290_v60  ;;  %v303_v11 = vrot.slane %v301_v2, 4  ;;  %v224_v62 = vld [vmem:[%s3302_s24 + $0x18] sm:$0xf] }
  0x2e   : > { %v472_v12 = vunpack.c.l.bf16 %v286_v8  ;;  %v2887_v14 = vpack.i.bf16 %v985_v4, %v984_v59  ;;  %v309_v17 = vrot.slane %v307_v6, 5  ;;  %v686_v41 = vrot.slane %v685_v25, 4  ;;  %v3470_v6 = vld [vmem:[%s3302_s24 + $0x1c] sm:$0xf] }
  0x2f   : > { %v295_v18 = vrot.slane %v294_v10, 4  ;;  %v304_v22 = vor.u32 %v303_v11, %v299_v5  ;;  %v688_v23 = vshll.u32 %v3306_v1, 16  ;;  %v698_v27 = vshll.u32 %v2560_v32, 16  ;;  %v3475_v10 = vld [vmem:[%s3302_s24 + $0x20] sm:$0x1] }
  0x30   : > { %v2892_v28 = vpack.i.bf16 %v472_v12, %v471_v9  ;;  %2888 = vrot.lane.b32.xlu1 %v2887_v14, %s3237_s27  ;;  %v662_v47 = vrot.slane %v661_v36, 4  ;;  %v664_v29 = vshll.u32 %v3311_v7, 16  ;;  %v674_v33 = vshll.u32 %v3333_v24, 16  ;;  %v3445_v36 = vld [vmem:[%s3302_s24 + $0x2c] sm:$0x1] }
  0x31   : > { %v300_v15 = vsel %vm3408_vm5, %v295_v18, %v299_v5  ;;  %v305_v16 = vrot.slane %v304_v22, 4  ;;  %v690_v25 = vrot.slane %v688_v23, 5  ;;  %v700_v34 = vrot.slane %v698_v27, 5  ;;  %v2609_v14 = vld [vmem:[%s3302_s24 + $0x18] sm:$0xe] }
  0x32   : > { %2893 = vrot.lane.b32.xlu0 %v2892_v28, %s3239_s29  ;;  %v473_v1 = vunpack.c.l.bf16 %v300_v15  ;;  %v666_v32 = vrot.slane %v664_v29, 5  ;;  %v676_v37 = vrot.slane %v674_v33, 5  ;;  %v1073_v21 = vor.u32 %v3360_v43, %v3358_v42 }
  0x33   : > { %v310_v7 = vsel %vm3408_vm5, %v305_v16, %v309_v17  ;;  %v691_v24 = vsel %vm3408_vm5, %v686_v41, %v690_v25  ;;  %v695_v26 = vor.u32 %v3327_v20, %v690_v25  ;;  %v1076_v38 = vshll.u32 %v3317_v13, 16  ;;  %v226_v25 = vld [vmem:[%s3302_s24 + $0x24] sm:$0xf] }
  0x34   : > { %v474_v39 = vunpack.c.l.bf16 %v310_v7  ;;  %v864_v40 = vunpack.c.l.bf16 %v691_v24  ;;  %v667_v44 = vsel %vm3408_vm5, %v662_v47, %v666_v32  ;;  %v671_v42 = vor.u32 %v3345_v31, %v666_v32 }
  0x35   : > { %v696_v43 = vrot.slane %v695_v26, 4  ;;  %v862_v46 = vunpack.c.l.bf16 %v667_v44  ;;  %v1074_v49 = vrot.slane %v1073_v21, 4  ;;  %v1078_v50 = vrot.slane %v1076_v38, 5 }
  0x36   : > { %v2897_v30 = vpack.i.bf16 %v474_v39, %v473_v1  ;;  %v672_v51 = vrot.slane %v671_v42, 4  ;;  %v1080_v20 = vshrl.u32 %v3317_v13, 16  ;;  %v1086_v52 = vshll.u32 %v3445_v36, 16 }
  0x37   : > { %v701_v35 = vsel %vm3408_vm5, %v696_v43, %v700_v34  ;;  %v1079_v55 = vsel %vm3408_vm5, %v1074_v49, %v1078_v50  ;;  %v1049_v31 = vor.u32 %v3377_v53, %v3372_v48  ;;  %v1052_v57 = vshll.u32 %v3325_v19, 16  ;;  %v227_v49 = vld [vmem:[%s3302_s24 + $0x28] sm:$0xf] }
  0x38   : > { %2898 = vrot.lane.b32.xlu0 %v2897_v30, %s3239_s29  ;;  %v865_v58 = vunpack.c.l.bf16 %v701_v35  ;;  %v677_v59 = vsel %vm3408_vm5, %v672_v51, %v676_v37  ;;  %v1082_v60 = vrot.slane %v1080_v20, 4  ;;  %v1088_v61 = vrot.slane %v1086_v52, 5  ;;  %v255_v52 = vld [vmem:[%s3302_s24 + $0x2c] sm:$0x1] }
  0x39   : > { %v863_v63 = vunpack.c.l.bf16 %v677_v59  ;;  %v1252_v0 = vunpack.c.l.bf16 %v1079_v55  ;;  %v1050_v2 = vrot.slane %v1049_v31, 4  ;;  %v1054_v3 = vrot.slane %v1052_v57, 5  ;;  %v2610_v57 = vld [vmem:[%s3302_s24 + $0x24] sm:$0xe] }
  0x3a   : > { %v2907_v4 = vpack.i.bf16 %v865_v58, %v864_v40  ;;  %v1083_v48 = vor.u32 %v1082_v60, %v1078_v50  ;;  %v1056_v53 = vshrl.u32 %v3325_v19, 16  ;;  %v1062_v5 = vshll.u32 %v3458_v56, 16 }
  0x3b   : > { %v2902_v8 = vpack.i.bf16 %v863_v63, %v862_v46  ;;  %v1055_v9 = vsel %vm3408_vm5, %v1050_v2, %v1054_v3  ;;  %v312_v11 = vshrl.u32 %v224_v62, 16  ;;  %v315_v12 = vshll.u32 %v224_v62, 16  ;;  %v3172_v62 = vld [vmem:[%s4250_s1] sm:$0xff]  }
  0x3c   : > { %2908 = vrot.lane.b32.xlu1 %v2907_v4, %s3240_s30  ;;  %v1084_v17 = vrot.slane %v1083_v48, 4  ;;  %v1058_v41 = vrot.slane %v1056_v53, 4  ;;  %v1064_v18 = vrot.slane %v1062_v5, 5  ;;  %v1250_v22 = vunpack.c.l.bf16 %v1055_v9  ;;  %v490_v4 = vld [vmem:[%s3302_s24 + $0x24] sm:$0xe]  ;;  %2755 = vmatprep.subr.bf16.mxu0 %v3172_v62 }
  0x3d   : > { %2903 = vrot.lane.b32.xlu0 %v2902_v8, %s3240_s30  ;;  %v314_v23 = vrot.slane %v312_v11, 4  ;;  %v317_v27 = vrot.slane %v315_v12, 5  ;;  %v321_v28 = vshll.u32 %v3470_v6, 16  ;;  %v325_v47 = vshrl.u32 %v3470_v6, 16  ;;  %2756 = vmatpush3.bf16.msra.mxu0 %v3172_v62 }
  0x3e   : > { %v1089_v29 = vsel %vm3408_vm5, %v1084_v17, %v1088_v61  ;;  %v1059_v33 = vor.u32 %v1058_v41, %v1054_v3  ;;  %v331_v15 = vshll.u32 %v3475_v10, 16  ;;  %v2617_v16 = vrot.slane %v2609_v14, 9  ;;  %v489_v17 = vld [vmem:[%s3302_s24 + $0x18] sm:$0xe]  ;;  %2787 = vmatprep.subr.bf16.mxu1 %v3172_v62 }
  0x3f   : > { %v1253_v34 = vunpack.c.l.bf16 %v1089_v29  ;;  %v318_v1 = vor.u32 %v317_v27, %v314_v23  ;;  %v323_v32 = vrot.slane %v321_v28, 5  ;;  %v327_v37 = vrot.slane %v325_v47, 4  ;;  %2795 = vmatpush3.bf16.msra.mxu1 %v3172_v62 }
  0x40   : > { %v1060_v21 = vrot.slane %v1059_v33, 4  ;;  %v333_v7 = vrot.slane %v331_v15, 5  ;;  %v1300_v24 = vrot.slane %v3325_v19, 5  ;;  %v1303_v26 = vrot.slane %v3458_v56, 5 }
  0x41   : > { %v2917_v38 = vpack.i.bf16 %v1253_v34, %v1252_v0  ;;  %v319_v39 = vrot.slane %v318_v1, 4  ;;  %v328_v40 = vor.u32 %v327_v37, %v323_v32  ;;  %v336_v44 = vshrl.u32 %v226_v25, 16 }
  0x42   : > { %v1065_v42 = vsel %vm3408_vm5, %v1060_v21, %v1064_v18  ;;  %v1301_v43 = vsel %vm3364_vm2, %v2617_v16, %v1300_v24  ;;  %v1302_v46 = vrot.slane %v1300_v24, 4  ;;  %v339_v50 = vshll.u32 %v226_v25, 16  ;;  %v3524_v24 = vld [vmem:[%s3302_s24 + $0x34] sm:$0xf] }
  0x43   : > { %2918 = vrot.lane.b32.xlu1 %v2917_v38, %s3241_s4  ;;  %v1251_v19 = vunpack.c.l.bf16 %v1065_v42  ;;  %v324_v30 = vsel %vm3408_vm5, %v319_v39, %v323_v32  ;;  %v329_v51 = vrot.slane %v328_v40, 4  ;;  %v1370_v20 = vunpack.c.l.bf16 %v1301_v43  ;;  %v2549_v32 = vld [vmem:[%s3302_s24 + $0x30] sm:$0xf] }
  0x44   : > { %v475_v35 = vunpack.c.l.bf16 %v324_v30  ;;  %v1304_v55 = vsel %vm3364_vm2, %v1302_v46, %v1303_v26  ;;  %v338_v56 = vrot.slane %v336_v44, 4  ;;  %v341_v31 = vrot.slane %v339_v50, 5 }
  0x45   : > { %v2912_v58 = vpack.i.bf16 %v1251_v19, %v1250_v22  ;;  %v334_v59 = vsel %vm3408_vm5, %v329_v51, %v333_v7  ;;  %v1371_v60 = vunpack.c.l.bf16 %v1304_v55  ;;  %v345_v61 = vshll.u32 %v227_v49, 16  ;;  %v2547_v51 = vld [vmem:[%s3302_s24 + $0x24] sm:$0xf]  ;;  %v3543_v55 = vld [vmem:[%s3302_s24 + $0x28] sm:$0xf] }
  0x46   : > { %v476_v63 = vunpack.c.l.bf16 %v334_v59  ;;  %v342_v0 = vor.u32 %v341_v31, %v338_v56  ;;  %v349_v2 = vshrl.u32 %v227_v49, 16  ;;  %v355_v3 = vshll.u32 %v255_v52, 16  ;;  %v3546_v31 = vld [vmem:[%s3302_s24 + $0x38] sm:$0x1] }
  0x47   : > { %2913 = vrot.lane.b32.xlu0 %v2912_v58, %s3241_s4  ;;  %v2922_v48 = vpack.i.bf16 %v1371_v60, %v1370_v20  ;;  %v347_v53 = vrot.slane %v345_v61, 5  ;;  %v2618_v5 = vrot.slane %v2610_v57, 9  ;;  %v1307_v8 = vrot.slane %v3317_v13, 5  ;;  %v3174_v61 = vld [vmem:[%s4250_s1 + $0x10] sm:$0xff]  }
  0x48   : > { %v2927_v9 = vpack.i.bf16 %v476_v63, %v475_v35  ;;  %v343_v11 = vrot.slane %v342_v0, 4  ;;  %v351_v12 = vrot.slane %v349_v2, 4  ;;  %v357_v14 = vrot.slane %v355_v3, 5 }
  0x49   : > { %v1308_v41 = vsel %vm3364_vm2, %v2618_v5, %v1307_v8  ;;  %v1309_v18 = vrot.slane %v1307_v8, 4  ;;  %v1310_v22 = vrot.slane %v3445_v36, 5  ;;  %v2536_v23 = vrot.slane %v490_v4, 9  ;;  %v3557_v5 = vld [vmem:[%s3302_s24 + $0x2c] sm:$0x1] }
  0x4a   : > { %2928 = vrot.lane.b32.xlu1 %v2927_v9, %s3239_s29  ;;  %v348_v13 = vsel %vm3408_vm5, %v343_v11, %v347_v53  ;;  %v352_v27 = vor.u32 %v351_v12, %v347_v53  ;;  %v1372_v28 = vunpack.c.l.bf16 %v1308_v41  ;;  %v545_v47 = vrot.slane %v227_v49, 5  ;;  %v2570_v8 = vld [vmem:[%s3302_s24 + $0x30] sm:$0xe]  ;;  %v3175_v9 = vld [vmem:[%s4250_s1 + $0x18] sm:$0xff]  }
  0x4b   : > { %2923 = vrot.lane.b32.xlu0 %v2922_v48, %s3242_s7  ;;  %v477_v29 = vunpack.c.l.bf16 %v348_v13  ;;  %v1311_v33 = vsel %vm3364_vm2, %v1309_v18, %v1310_v22  ;;  %v548_v36 = vrot.slane %v255_v52, 5  ;;  %v2535_v15 = vrot.slane %v489_v17, 9 }
  0x4c   : > { %v353_v16 = vrot.slane %v352_v27, 4  ;;  %v1373_v25 = vunpack.c.l.bf16 %v1311_v33  ;;  %v546_v34 = vsel %vm3364_vm2, %v2536_v23, %v545_v47  ;;  %v547_v1 = vrot.slane %v545_v47, 4 }
  0x4d   : > { %v600_v37 = vunpack.c.l.bf16 %v546_v34  ;;  %v538_v21 = vrot.slane %v3470_v6, 5  ;;  %v541_v7 = vrot.slane %v3475_v10, 5  ;;  %v636_v26 = vunpack.c.l.bf16 %v2549_v32  ;;  %v3173_v6 = vld [vmem:[%s4250_s1 + $0x8] sm:$0xff]  }
  0x4e   : > { %v358_v38 = vsel %vm3408_vm5, %v353_v16, %v357_v14  ;;  %v2932_v39 = vpack.i.bf16 %v1373_v25, %v1372_v28  ;;  %v549_v40 = vsel %vm3364_vm2, %v547_v1, %v548_v36  ;;  %v637_v44 = vunpack.c.l.bf16 %v3524_v24  ;;  %2757 = vmatprep.subr.bf16.mxu0 %v3173_v6  ;;  %2788 = vmatprep.subr.bf16.mxu1 %v3173_v6  ;;  %v2569_v25 = vld [vmem:[%s3302_s24 + $0x24] sm:$0xe] }
  0x4f   : > { %v478_v42 = vunpack.c.l.bf16 %v358_v38  ;;  %v601_v10 = vunpack.c.l.bf16 %v549_v40  ;;  %v539_v43 = vsel %vm3364_vm2, %v2535_v15, %v538_v21  ;;  %v540_v46 = vrot.slane %v538_v21, 4  ;;  %2758 = vmatpush3.bf16.msra.mxu0 %v3173_v6  ;;  %2796 = vmatpush3.bf16.msra.mxu1 %v3173_v6 }
  0x50   : > { %2933 = vrot.lane.b32.xlu0 %v2932_v39, %s3242_s7  ;;  %v598_v49 = vunpack.c.l.bf16 %v539_v43  ;;  %v727_v50 = vshrl.u32 %v2549_v32, 16  ;;  %v730_v19 = vshll.u32 %v2549_v32, 16  ;;  %v3537_v30 = vpack.i.bf16 %v637_v44, %v636_v26  ;;  %2759 = vmatprep.subr.bf16.mxu0 %v3174_v61 }
  0x51   : > { %v2937_v20 = vpack.i.bf16 %v478_v42, %v477_v29  ;;  %v2947_v52 = vpack.i.bf16 %v601_v10, %v600_v37  ;;  %v542_v35 = vsel %vm3364_vm2, %v540_v46, %v541_v7  ;;  %v634_v56 = vunpack.c.l.bf16 %v2547_v51  ;;  %2789 = vmatprep.subr.bf16.mxu1 %v3174_v61  ;;  %v3176_v29 = vld [vmem:[%s4250_s1 + $0x20] sm:$0xff]   ;;  %v2591_v42 = vld [vmem:[%s3302_s24 + $0x3c] sm:$0xf] }
  0x52   : > { %v599_v57 = vunpack.c.l.bf16 %v542_v35  ;;  %v729_v58 = vrot.slane %v727_v50, 4  ;;  %v732_v59 = vrot.slane %v730_v19, 5  ;;  %v635_v60 = vunpack.c.l.bf16 %v3543_v55 }
  0x53   : > { %2938 = vrot.lane.b32.xlu1 %v2937_v20, %s3239_s29  ;;  %v703_v62 = vshrl.u32 %v2547_v51, 16  ;;  %v706_v63 = vshll.u32 %v2547_v51, 16  ;;  %v736_v0 = vshll.u32 %v3524_v24, 16  ;;  %v740_v2 = vshrl.u32 %v3524_v24, 16  ;;  %2760 = vmatpush3.bf16.msra.mxu0 %v3174_v61  ;;  %v3594_v51 = vld [vmem:[%s3302_s24 + $0x40] sm:$0xf] }
  0x54   : > { %v2942_v3 = vpack.i.bf16 %v599_v57, %v598_v49  ;;  %v2952_v4 = vpack.i.bf16 %v635_v60, %v634_v56  ;;  %v733_v48 = vor.u32 %v732_v59, %v729_v58  ;;  %v746_v53 = vshll.u32 %v3546_v31, 16  ;;  %2761 = vmatprep.subr.bf16.mxu0 %v3175_v9  ;;  %2797 = vmatpush3.bf16.msra.mxu1 %v3174_v61  ;;  %v2589_v61 = vld [vmem:[%s3302_s24 + $0x30] sm:$0xf] }
  0x55   : > { %v705_v11 = vrot.slane %v703_v62, 4  ;;  %v708_v12 = vrot.slane %v706_v63, 5  ;;  %v738_v14 = vrot.slane %v736_v0, 5  ;;  %v742_v17 = vrot.slane %v740_v2, 4  ;;  %2790 = vmatprep.subr.bf16.mxu1 %v3175_v9 }
  0x56   : > { %2943 = vrot.lane.b32.xlu0 %v2942_v3, %s3238_s28  ;;  %v734_v41 = vrot.slane %v733_v48, 4  ;;  %v748_v18 = vrot.slane %v746_v53, 5  ;;  %v712_v22 = vshll.u32 %v3543_v55, 16  ;;  %v716_v23 = vshrl.u32 %v3543_v55, 16  ;;  %v3607_v3 = vld [vmem:[%s3302_s24 + $0x34] sm:$0xf] }
  0x57   : > { %2948 = vrot.lane.b32.xlu1 %v2947_v52, %s3238_s28  ;;  %v743_v13 = vor.u32 %v742_v17, %v738_v14  ;;  %v709_v27 = vor.u32 %v708_v12, %v705_v11  ;;  %v722_v28 = vshll.u32 %v3557_v5, 16  ;;  %v2578_v47 = vrot.slane %v2570_v8, 9  ;;  %2762 = vmatpush3.bf16.msra.mxu0 %v3175_v9  ;;  %v3179_v17 = vld [vmem:[%s4250_s1 + $0x38] sm:$0xff]  }
  0x58   : > { %v739_v33 = vsel %vm3408_vm5, %v734_v41, %v738_v14  ;;  %v714_v36 = vrot.slane %v712_v22, 5  ;;  %v718_v15 = vrot.slane %v716_v23, 4  ;;  %v933_v16 = vrot.slane %v3524_v24, 5  ;;  %2763 = vmatprep.subr.bf16.mxu0 %v3176_v29  ;;  %v3177_v24 = vld [vmem:[%s4250_s1 + $0x28] sm:$0xff]   ;;  %2798 = vmatpush3.bf16.msra.mxu1 %v3175_v9 }
  0x59   : > { %v744_v34 = vrot.slane %v743_v13, 4  ;;  %v868_v1 = vunpack.c.l.bf16 %v739_v33  ;;  %v710_v32 = vrot.slane %v709_v27, 4  ;;  %v724_v37 = vrot.slane %v722_v28, 5  ;;  %2791 = vmatprep.subr.bf16.mxu1 %v3176_v29  ;;  %v3623_v13 = vld [vmem:[%s3302_s24 + $0x38] sm:$0x1] }
  0x5a   : > { %2953 = vrot.lane.b32.xlu0 %v2952_v4, %s3235_s25  ;;  %v719_v21 = vor.u32 %v718_v15, %v714_v36  ;;  %v934_v7 = vsel %vm3364_vm2, %v2578_v47, %v933_v16  ;;  %v935_v26 = vrot.slane %v933_v16, 4  ;;  %v936_v38 = vrot.slane %v3546_v31, 5  ;;  %v3610_v4 = vld [vmem:[%s3302_s24 + $0x44] sm:$0x1]  ;;  %v228_v33 = vld [vmem:[%s3302_s24 + $0x30] sm:$0xf] }
  0x5b   : > { %2958 = vrot.lane.b32.xlu1 %v3537_v30, %s3235_s25  ;;  %v749_v39 = vsel %vm3408_vm5, %v744_v34, %v748_v18  ;;  %v715_v40 = vsel %vm3408_vm5, %v710_v32, %v714_v36  ;;  %v988_v44 = vunpack.c.l.bf16 %v934_v7  ;;  %v2577_v6 = vrot.slane %v2569_v25, 9  ;;  %2764 = vmatpush3.bf16.msra.mxu0 %v3176_v29 }
  0x5c   : > { %v869_v10 = vunpack.c.l.bf16 %v749_v39  ;;  %v720_v43 = vrot.slane %v719_v21, 4  ;;  %v866_v46 = vunpack.c.l.bf16 %v715_v40  ;;  %v937_v49 = vsel %vm3364_vm2, %v935_v26, %v936_v38  ;;  %2765 = vmatprep.subr.bf16.mxu0 %v3177_v24  ;;  %2799 = vmatpush3.bf16.msra.mxu1 %v3176_v29  ;;  %v3632_v26 = vld [vmem:[%s3302_s24 + $0x34] sm:$0xf] }
  0x5d   : > { %v989_v50 = vunpack.c.l.bf16 %v937_v49  ;;  %v926_v19 = vrot.slane %v3543_v55, 5  ;;  %v929_v30 = vrot.slane %v3557_v5, 5  ;;  %v1024_v20 = vunpack.c.l.bf16 %v2591_v42  ;;  %v3178_v55 = vld [vmem:[%s4250_s1 + $0x30] sm:$0xff]   ;;  %2792 = vmatprep.subr.bf16.mxu1 %v3177_v24 }
  0x5e   : > { %v2967_v52 = vpack.i.bf16 %v869_v10, %v868_v1  ;;  %v725_v35 = vsel %vm3408_vm5, %v720_v43, %v724_v37  ;;  %v1025_v56 = vunpack.c.l.bf16 %v3594_v51  ;;  %v1115_v31 = vshrl.u32 %v2591_v42, 16 }
  0x5f   : > { %v867_v57 = vunpack.c.l.bf16 %v725_v35  ;;  %v2977_v58 = vpack.i.bf16 %v989_v50, %v988_v44  ;;  %v927_v59 = vsel %vm3364_vm2, %v2577_v6, %v926_v19  ;;  %v928_v60 = vrot.slane %v926_v19, 4  ;;  %2766 = vmatpush3.bf16.msra.mxu0 %v3177_v24 }
  0x60   : > { %2968 = vrot.lane.b32.xlu1 %v2967_v52, %s3240_s30  ;;  %v986_v62 = vunpack.c.l.bf16 %v927_v59  ;;  %v1117_v63 = vrot.slane %v1115_v31, 4  ;;  %v1118_v0 = vshll.u32 %v2591_v42, 16  ;;  %v2987_v2 = vpack.i.bf16 %v1025_v56, %v1024_v20  ;;  %2767 = vmatprep.subr.bf16.mxu0 %v3178_v55  ;;  %v3638_v42 = vld [vmem:[%s3302_s24 + $0x38] sm:$0x1]  ;;  %v2611_v52 = vld [vmem:[%s3302_s24 + $0x30] sm:$0xe] }
  0x61   : > { %v2962_v48 = vpack.i.bf16 %v867_v57, %v866_v46  ;;  %v930_v53 = vsel %vm3364_vm2, %v928_v60, %v929_v30  ;;  %v1022_v5 = vunpack.c.l.bf16 %v2589_v61  ;;  %v1023_v8 = vunpack.c.l.bf16 %v3607_v3  ;;  %2800 = vmatpush3.bf16.msra.mxu1 %v3177_v24 }
  0x62   : > { %v987_v9 = vunpack.c.l.bf16 %v930_v53  ;;  %v1120_v11 = vrot.slane %v1118_v0, 5  ;;  %v1091_v12 = vshrl.u32 %v2589_v61, 16  ;;  %v1094_v14 = vshll.u32 %v2589_v61, 16  ;;  %2793 = vmatprep.subr.bf16.mxu1 %v3178_v55 }
  0x63   : > { %2963 = vrot.lane.b32.xlu0 %v2962_v48, %s3240_s30  ;;  %v2982_v41 = vpack.i.bf16 %v1023_v8, %v1022_v5  ;;  %v1124_v18 = vshll.u32 %v3594_v51, 16  ;;  %v1128_v22 = vshrl.u32 %v3594_v51, 16  ;;  %v1134_v23 = vshll.u32 %v3610_v4, 16  ;;  %2768 = vmatpush3.bf16.msra.mxu0 %v3178_v55 }
  0x64   : > { %2978 = vrot.lane.b32.xlu1 %v2977_v58, %s3237_s27  ;;  %v2972_v27 = vpack.i.bf16 %v987_v9, %v986_v62  ;;  %v1093_v28 = vrot.slane %v1091_v12, 4  ;;  %v1096_v47 = vrot.slane %v1094_v14, 5  ;;  %v1121_v29 = vor.u32 %v1120_v11, %v1117_v63  ;;  %2769 = vmatprep.subr.bf16.mxu0 %v3179_v17  ;;  %v231_v9 = vld [vmem:[%s3302_s24 + $0x40] sm:$0xf] }
  0x65   : > { %v1126_v36 = vrot.slane %v1124_v18, 5  ;;  %v1130_v15 = vrot.slane %v1128_v22, 4  ;;  %v1136_v16 = vrot.slane %v1134_v23, 5  ;;  %v1100_v25 = vshll.u32 %v3607_v3, 16  ;;  %2801 = vmatpush3.bf16.msra.mxu1 %v3178_v55  ;;  %v257_v22 = vld [vmem:[%s3302_s24 + $0x44] sm:$0x1] }
  0x66   : > { %v1122_v34 = vrot.slane %v1121_v29, 4  ;;  %v1097_v1 = vor.u32 %v1096_v47, %v1093_v28  ;;  %v1104_v32 = vshrl.u32 %v3607_v3, 16  ;;  %v1110_v37 = vshll.u32 %v3623_v13, 16  ;;  %2794 = vmatprep.subr.bf16.mxu1 %v3179_v17  ;;  %v2612_v29 = vld [vmem:[%s3302_s24 + $0x3c] sm:$0xe] }
  0x67   : > { %2973 = vrot.lane.b32.xlu0 %v2972_v27, %s3237_s27  ;;  %v1131_v21 = vor.u32 %v1130_v15, %v1126_v36  ;;  %v1102_v7 = vrot.slane %v1100_v25, 5  ;;  %v360_v38 = vshrl.u32 %v228_v33, 16  ;;  %v363_v24 = vshll.u32 %v228_v33, 16  ;;  %2770 = vmatpush3.bf16.msra.mxu0 %v3179_v17 }
  0x68   : > { %2988 = vrot.lane.b32.xlu1 %v2987_v2, %s3236_s26  ;;  %v1127_v39 = vsel %vm3408_vm5, %v1122_v34, %v1126_v36  ;;  %v1098_v40 = vrot.slane %v1097_v1, 4  ;;  %v1106_v44 = vrot.slane %v1104_v32, 4  ;;  %v1112_v6 = vrot.slane %v1110_v37, 5  ;;  %v230_v2 = vld [vmem:[%s3302_s24 + $0x3c] sm:$0xf] }
  0x69   : > { %v1132_v10 = vrot.slane %v1131_v21, 4  ;;  %v1256_v43 = vunpack.c.l.bf16 %v1127_v39  ;;  %v362_v46 = vrot.slane %v360_v38, 4  ;;  %v365_v49 = vrot.slane %v363_v24, 5  ;;  %2802 = vmatpush3.bf16.msra.mxu1 %v3179_v17  ;;  %v492_v37 = vld [vmem:[%s3302_s24 + $0x3c] sm:$0xe] }
  0x6a   : > { %v1103_v50 = vsel %vm3408_vm5, %v1098_v40, %v1102_v7  ;;  %v1107_v19 = vor.u32 %v1106_v44, %v1102_v7  ;;  %v369_v30 = vshll.u32 %v3632_v26, 16  ;;  %v373_v20 = vshrl.u32 %v3632_v26, 16 }
  0x6b   : > { %2983 = vrot.lane.b32.xlu0 %v2982_v41, %s3236_s26  ;;  %v1137_v35 = vsel %vm3408_vm5, %v1132_v10, %v1136_v16  ;;  %v1254_v56 = vunpack.c.l.bf16 %v1103_v50  ;;  %v366_v31 = vor.u32 %v365_v49, %v362_v46  ;;  %v379_v55 = vshll.u32 %v3638_v42, 16  ;;  %v491_v10 = vld [vmem:[%s3302_s24 + $0x30] sm:$0xe] }
  0x6c   : > { %v1257_v57 = vunpack.c.l.bf16 %v1137_v35  ;;  %v1108_v58 = vrot.slane %v1107_v19, 4  ;;  %v371_v59 = vrot.slane %v369_v30, 5  ;;  %v375_v60 = vrot.slane %v373_v20, 4 }
  0x6d   : > { %v367_v61 = vrot.slane %v366_v31, 4  ;;  %v381_v62 = vrot.slane %v379_v55, 5  ;;  %v2619_v63 = vrot.slane %v2611_v52, 9  ;;  %v1314_v0 = vrot.slane %v3607_v3, 5 }
  0x6e   : > { %v2997_v48 = vpack.i.bf16 %v1257_v57, %v1256_v43  ;;  %v1113_v53 = vsel %vm3408_vm5, %v1108_v58, %v1112_v6  ;;  %v376_v5 = vor.u32 %v375_v60, %v371_v59  ;;  %v1317_v8 = vrot.slane %v3623_v13, 5 }
  0x6f   : > { %v1255_v11 = vunpack.c.l.bf16 %v1113_v53  ;;  %v372_v12 = vsel %vm3408_vm5, %v367_v61, %v371_v59  ;;  %v1315_v14 = vsel %vm3364_vm2, %v2619_v63, %v1314_v0  ;;  %v1316_v17 = vrot.slane %v1314_v0, 4  ;;  %v2553_v63 = vld [vmem:[%s3302_s24 + $0x48] sm:$0xf] }
  0x70   : > { %2998 = vrot.lane.b32.xlu1 %v2997_v48, %s3241_s4  ;;  %v377_v3 = vrot.slane %v376_v5, 4  ;;  %v479_v41 = vunpack.c.l.bf16 %v372_v12  ;;  %v1374_v18 = vunpack.c.l.bf16 %v1315_v14  ;;  %v384_v23 = vshrl.u32 %v230_v2, 16 }
  0x71   : > { %v2992_v27 = vpack.i.bf16 %v1255_v11, %v1254_v56  ;;  %v1318_v13 = vsel %vm3364_vm2, %v1316_v17, %v1317_v8  ;;  %v387_v28 = vshll.u32 %v230_v2, 16  ;;  %v393_v47 = vshll.u32 %v231_v9, 16 }
  0x72   : > { %v382_v33 = vsel %vm3408_vm5, %v377_v3, %v381_v62  ;;  %v1375_v36 = vunpack.c.l.bf16 %v1318_v13  ;;  %v386_v15 = vrot.slane %v384_v23, 4  ;;  %v397_v16 = vshrl.u32 %v231_v9, 16 }
  0x73   : > { %2993 = vrot.lane.b32.xlu0 %v2992_v27, %s3241_s4  ;;  %v480_v25 = vunpack.c.l.bf16 %v382_v33  ;;  %v389_v34 = vrot.slane %v387_v28, 5  ;;  %v395_v1 = vrot.slane %v393_v47, 5  ;;  %v403_v32 = vshll.u32 %v257_v22, 16 }
  0x74   : > { %v3002_v21 = vpack.i.bf16 %v1375_v36, %v1374_v18  ;;  %v399_v7 = vrot.slane %v397_v16, 4  ;;  %v2620_v38 = vrot.slane %v2612_v29, 9  ;;  %v1321_v24 = vrot.slane %v3594_v51, 5  ;;  %v2552_v18 = vld [vmem:[%s3302_s24 + $0x40] sm:$0xf] }
  0x75   : > { %v3007_v39 = vpack.i.bf16 %v480_v25, %v479_v41  ;;  %v390_v40 = vor.u32 %v389_v34, %v386_v15  ;;  %v405_v44 = vrot.slane %v403_v32, 5  ;;  %v1324_v6 = vrot.slane %v3610_v4, 5  ;;  %v2551_v41 = vld [vmem:[%s3302_s24 + $0x3c] sm:$0xf] }
  0x76   : > { %v400_v43 = vor.u32 %v399_v7, %v395_v1  ;;  %v1322_v46 = vsel %vm3364_vm2, %v2620_v38, %v1321_v24  ;;  %v1323_v49 = vrot.slane %v1321_v24, 4  ;;  %v2538_v50 = vrot.slane %v492_v37, 9  ;;  %v2572_v7 = vld [vmem:[%s3302_s24 + $0x48] sm:$0xe] }
  0x77   : > { %3008 = vrot.lane.b32.xlu1 %v3007_v39, %s3239_s29  ;;  %3003 = vrot.lane.b32.xlu0 %v3002_v21, %s3242_s7  ;;  %v391_v19 = vrot.slane %v390_v40, 4  ;;  %v1376_v30 = vunpack.c.l.bf16 %v1322_v46  ;;  %v559_v51 = vrot.slane %v231_v9, 5  ;;  %v562_v20 = vrot.slane %v257_v22, 5  ;;  %v2554_v9 = vld [vmem:[%s3302_s24 + $0x4c] sm:$0xf] }
  0x78   : > { %v401_v52 = vrot.slane %v400_v43, 4  ;;  %v1325_v4 = vsel %vm3364_vm2, %v1323_v49, %v1324_v6  ;;  %v2537_v35 = vrot.slane %v491_v10, 9  ;;  %v552_v56 = vrot.slane %v3632_v26, 5  ;;  %v2563_v21 = vld [vmem:[%s3302_s24 + $0x44] sm:$0x1] }
  0x79   : > { %v396_v31 = vsel %vm3408_vm5, %v391_v19, %v395_v1  ;;  %v1377_v55 = vunpack.c.l.bf16 %v1325_v4  ;;  %v560_v57 = vsel %vm3364_vm2, %v2538_v50, %v559_v51  ;;  %v561_v58 = vrot.slane %v559_v51, 4  ;;  %v2571_v4 = vld [vmem:[%s3302_s24 + $0x3c] sm:$0xe] }
  0x7a   : > { %v406_v59 = vsel %vm3408_vm5, %v401_v52, %v405_v44  ;;  %v481_v60 = vunpack.c.l.bf16 %v396_v31  ;;  %v604_v61 = vunpack.c.l.bf16 %v560_v57  ;;  %v553_v62 = vsel %vm3364_vm2, %v2537_v35, %v552_v56 }
  0x7b   : > { %v482_v26 = vunpack.c.l.bf16 %v406_v59  ;;  %v3012_v0 = vpack.i.bf16 %v1377_v55, %v1376_v30  ;;  %v563_v2 = vsel %vm3364_vm2, %v561_v58, %v562_v20  ;;  %v554_v48 = vrot.slane %v552_v56, 4 }
  0x7c   : > { %v605_v53 = vunpack.c.l.bf16 %v563_v2  ;;  %v555_v5 = vrot.slane %v3638_v42, 5  ;;  %v602_v8 = vunpack.c.l.bf16 %v553_v62  ;;  %v640_v11 = vunpack.c.l.bf16 %v2553_v63  ;;  %v2564_v42 = vld [vmem:[%s3302_s24 + $0x50] sm:$0x1] }
  0x7d   : > { %v3017_v12 = vpack.i.bf16 %v482_v26, %v481_v60  ;;  %3013 = vrot.lane.b32.xlu0 %v3012_v0, %s3242_s7  ;;  %v641_v14 = vunpack.c.l.bf16 %v2554_v9  ;;  %v775_v17 = vshrl.u32 %v2553_v63, 16  ;;  %v778_v3 = vshll.u32 %v2553_v63, 16 }
  0x7e   : > { %v3027_v22 = vpack.i.bf16 %v605_v53, %v604_v61  ;;  %v556_v23 = vsel %vm3364_vm2, %v554_v48, %v555_v5  ;;  %v638_v27 = vunpack.c.l.bf16 %v2551_v41  ;;  %v639_v13 = vunpack.c.l.bf16 %v2552_v18 }
  0x7f   : > { %3018 = vrot.lane.b32.xlu1 %v3017_v12, %s3239_s29  ;;  %v603_v28 = vunpack.c.l.bf16 %v556_v23  ;;  %v777_v47 = vrot.slane %v775_v17, 4  ;;  %v780_v29 = vrot.slane %v778_v3, 5  ;;  %v3037_v33 = vpack.i.bf16 %v641_v14, %v640_v11  ;;  %v2595_v12 = vld [vmem:[%s3302_s24 + $0x54] sm:$0xf] }
  0x80   : > { %v751_v36 = vshrl.u32 %v2551_v41, 16  ;;  %v754_v15 = vshll.u32 %v2551_v41, 16  ;;  %v3032_v16 = vpack.i.bf16 %v639_v13, %v638_v27  ;;  %v784_v25 = vshll.u32 %v2554_v9, 16  ;;  %v3721_v41 = vld [vmem:[%s3302_s24 + $0x58] sm:$0xf] }
  0x81   : > { %v3022_v34 = vpack.i.bf16 %v603_v28, %v602_v8  ;;  %v781_v1 = vor.u32 %v780_v29, %v777_v47  ;;  %v788_v32 = vshrl.u32 %v2554_v9, 16  ;;  %v794_v37 = vshll.u32 %v2564_v42, 16 }
  0x82   : > { %v753_v38 = vrot.slane %v751_v36, 4  ;;  %v756_v24 = vrot.slane %v754_v15, 5  ;;  %v786_v39 = vrot.slane %v784_v25, 5  ;;  %v760_v40 = vshll.u32 %v2552_v18, 16 }
  0x83   : > { %3028 = vrot.lane.b32.xlu1 %v3027_v22, %s3238_s28  ;;  %3023 = vrot.lane.b32.xlu0 %v3022_v34, %s3238_s28  ;;  %v782_v44 = vrot.slane %v781_v1, 4  ;;  %v790_v6 = vrot.slane %v788_v32, 4  ;;  %v796_v10 = vrot.slane %v794_v37, 5  ;;  %v764_v43 = vshrl.u32 %v2552_v18, 16  ;;  %v3733_v1 = vld [vmem:[%s3302_s24 + $0x5c] sm:$0x1] }
  0x84   : > { %v757_v46 = vor.u32 %v756_v24, %v753_v38  ;;  %v762_v49 = vrot.slane %v760_v40, 5  ;;  %v770_v50 = vshll.u32 %v2563_v21, 16  ;;  %v2580_v19 = vrot.slane %v2572_v7, 9 }
  0x85   : > { %v787_v30 = vsel %vm3408_vm5, %v782_v44, %v786_v39  ;;  %v791_v51 = vor.u32 %v790_v6, %v786_v39  ;;  %v766_v20 = vrot.slane %v764_v43, 4  ;;  %v947_v52 = vrot.slane %v2554_v9, 5  ;;  %v3739_v44 = vld [vmem:[%s3302_s24 + $0x50] sm:$0x1] }
  0x86   : > { %v872_v35 = vunpack.c.l.bf16 %v787_v30  ;;  %v758_v56 = vrot.slane %v757_v46, 4  ;;  %v772_v31 = vrot.slane %v770_v50, 5  ;;  %v950_v55 = vrot.slane %v2564_v42, 5  ;;  %v2593_v42 = vld [vmem:[%s3302_s24 + $0x48] sm:$0xf] }
  0x87   : > { %3038 = vrot.lane.b32.xlu1 %v3037_v33, %s3235_s25  ;;  %3033 = vrot.lane.b32.xlu0 %v3032_v16, %s3235_s25  ;;  %v792_v57 = vrot.slane %v791_v51, 4  ;;  %v767_v58 = vor.u32 %v766_v20, %v762_v49  ;;  %v948_v59 = vsel %vm3364_vm2, %v2580_v19, %v947_v52  ;;  %v949_v60 = vrot.slane %v947_v52, 4  ;;  %v3728_v33 = vld [vmem:[%s3302_s24 + $0x4c] sm:$0xf] }
  0x88   : > { %v763_v61 = vsel %vm3408_vm5, %v758_v56, %v762_v49  ;;  %v992_v62 = vunpack.c.l.bf16 %v948_v59  ;;  %v2579_v63 = vrot.slane %v2571_v4, 9  ;;  %v940_v26 = vrot.slane %v2552_v18, 5  ;;  %v232_v49 = vld [vmem:[%s3302_s24 + $0x48] sm:$0xf] }
  0x89   : > { %v797_v0 = vsel %vm3408_vm5, %v792_v57, %v796_v10  ;;  %v768_v2 = vrot.slane %v767_v58, 4  ;;  %v870_v48 = vunpack.c.l.bf16 %v763_v61  ;;  %v951_v53 = vsel %vm3364_vm2, %v949_v60, %v950_v55  ;;  %v3749_v57 = vld [vmem:[%s3302_s24 + $0x4c] sm:$0xf] }
  0x8a   : > { %v873_v5 = vunpack.c.l.bf16 %v797_v0  ;;  %v993_v8 = vunpack.c.l.bf16 %v951_v53  ;;  %v941_v9 = vsel %vm3364_vm2, %v2579_v63, %v940_v26  ;;  %v942_v11 = vrot.slane %v940_v26, 4 }
  0x8b   : > { %v773_v14 = vsel %vm3408_vm5, %v768_v2, %v772_v31  ;;  %v943_v17 = vrot.slane %v2563_v21, 5  ;;  %v990_v3 = vunpack.c.l.bf16 %v941_v9  ;;  %v1028_v18 = vunpack.c.l.bf16 %v2595_v12 }
  0x8c   : > { %v3047_v22 = vpack.i.bf16 %v873_v5, %v872_v35  ;;  %v871_v23 = vunpack.c.l.bf16 %v773_v14  ;;  %v3057_v27 = vpack.i.bf16 %v993_v8, %v992_v62  ;;  %v1029_v13 = vunpack.c.l.bf16 %v3721_v41  ;;  %v3754_v62 = vld [vmem:[%s3302_s24 + $0x50] sm:$0x1]  ;;  %v3756_v26 = vpop.permute.xlu1 %2858  ;;  %v2613_v14 = vld [vmem:[%s3302_s24 + $0x48] sm:$0xe] }
  0x8d   : > { %v944_v28 = vsel %vm3364_vm2, %v942_v11, %v943_v17  ;;  %v1163_v47 = vshrl.u32 %v2595_v12, 16  ;;  %v1166_v29 = vshll.u32 %v2595_v12, 16  ;;  %v1026_v36 = vunpack.c.l.bf16 %v2593_v42  ;;  %v3758_v0 = vpop.permute.xlu0 %2853 }
  0x8e   : > { %3048 = vrot.lane.b32.xlu1 %v3047_v22, %s3240_s30  ;;  %v3042_v15 = vpack.i.bf16 %v871_v23, %v870_v48  ;;  %v991_v16 = vunpack.c.l.bf16 %v944_v28  ;;  %v3067_v25 = vpack.i.bf16 %v1029_v13, %v1028_v18  ;;  %v1027_v34 = vunpack.c.l.bf16 %v3728_v33  ;;  %v234_v28 = vld [vmem:[%s3302_s24 + $0x54] sm:$0xf] }
  0x8f   : > { %v1165_v32 = vrot.slane %v1163_v47, 4  ;;  %v1168_v37 = vrot.slane %v1166_v29, 5  ;;  %v1139_v21 = vshrl.u32 %v2593_v42, 16  ;;  %v1142_v7 = vshll.u32 %v2593_v42, 16 }
  0x90   : > { %3043 = vrot.lane.b32.xlu0 %v3042_v15, %s3240_s30  ;;  %v3052_v38 = vpack.i.bf16 %v991_v16, %v990_v3  ;;  %v3062_v24 = vpack.i.bf16 %v1027_v34, %v1026_v36  ;;  %v1172_v39 = vshll.u32 %v3721_v41, 16  ;;  %v1176_v40 = vshrl.u32 %v3721_v41, 16 }
  0x91   : > { %v1141_v6 = vrot.slane %v1139_v21, 4  ;;  %v1144_v10 = vrot.slane %v1142_v7, 5  ;;  %v1169_v43 = vor.u32 %v1168_v37, %v1165_v32  ;;  %v1182_v46 = vshll.u32 %v3733_v1, 16  ;;  %v3774_v37 = vpop.permute.xlu1 %2868 }
  0x92   : > { %3058 = vrot.lane.b32.xlu1 %v3057_v27, %s3237_s27  ;;  %v1174_v50 = vrot.slane %v1172_v39, 5  ;;  %v1178_v19 = vrot.slane %v1176_v40, 4  ;;  %v1148_v30 = vshll.u32 %v3728_v33, 16  ;;  %v1152_v51 = vshrl.u32 %v3728_v33, 16  ;;  %v3776_v21 = vpop.permute.xlu0 %2863  ;;  %v3782_v39 = vld [vmem:[%s3302_s24 + $0x58] sm:$0xf] }
  0x93   : > { %v1170_v20 = vrot.slane %v1169_v43, 4  ;;  %v1184_v52 = vrot.slane %v1182_v46, 5  ;;  %v1145_v4 = vor.u32 %v1144_v10, %v1141_v6  ;;  %v1158_v35 = vshll.u32 %v3739_v44, 16  ;;  %v259_v46 = vld [vmem:[%s3302_s24 + $0x5c] sm:$0x1] }
  0x94   : > { %3053 = vrot.lane.b32.xlu0 %v3052_v38, %s3237_s27  ;;  %v1179_v56 = vor.u32 %v1178_v19, %v1174_v50  ;;  %v1150_v31 = vrot.slane %v1148_v30, 5  ;;  %v1154_v55 = vrot.slane %v1152_v51, 4  ;;  %v408_v58 = vshrl.u32 %v232_v49, 16 }
  0x95   : > { %v1175_v59 = vsel %vm3408_vm5, %v1170_v20, %v1174_v50  ;;  %v1146_v60 = vrot.slane %v1145_v4, 4  ;;  %v1160_v61 = vrot.slane %v1158_v35, 5  ;;  %v411_v63 = vshll.u32 %v232_v49, 16  ;;  %v2614_v49 = vld [vmem:[%s3302_s24 + $0x54] sm:$0xe] }
  0x96   : > { %3068 = vrot.lane.b32.xlu1 %v3067_v25, %s3236_s26  ;;  %v1180_v2 = vrot.slane %v1179_v56, 4  ;;  %v1260_v48 = vunpack.c.l.bf16 %v1175_v59  ;;  %v1155_v53 = vor.u32 %v1154_v55, %v1150_v31  ;;  %v410_v5 = vrot.slane %v408_v58, 4  ;;  %v494_v58 = vld [vmem:[%s3302_s24 + $0x54] sm:$0xe] }
  0x97   : > { %v1151_v8 = vsel %vm3408_vm5, %v1146_v60, %v1150_v31  ;;  %v413_v9 = vrot.slane %v411_v63, 5  ;;  %v417_v11 = vshll.u32 %v3749_v57, 16  ;;  %v421_v12 = vshrl.u32 %v3749_v57, 16 }
  0x98   : > { %3063 = vrot.lane.b32.xlu0 %v3062_v24, %s3236_s26  ;;  %v1185_v17 = vsel %vm3408_vm5, %v1180_v2, %v1184_v52  ;;  %v1156_v3 = vrot.slane %v1155_v53, 4  ;;  %v1258_v18 = vunpack.c.l.bf16 %v1151_v8  ;;  %v427_v22 = vshll.u32 %v3754_v62, 16 }
  0x99   : > { %v1261_v23 = vunpack.c.l.bf16 %v1185_v17  ;;  %v414_v27 = vor.u32 %v413_v9, %v410_v5  ;;  %v419_v13 = vrot.slane %v417_v11, 5  ;;  %v423_v42 = vrot.slane %v421_v12, 4  ;;  %v3798_v2 = vpop.permute.xlu0 %2883  ;;  %v493_v11 = vld [vmem:[%s3302_s24 + $0x48] sm:$0xe] }
  0x9a   : > { %v1161_v47 = vsel %vm3408_vm5, %v1156_v3, %v1160_v61  ;;  %v429_v29 = vrot.slane %v427_v22, 5  ;;  %v2621_v36 = vrot.slane %v2613_v14, 9  ;;  %v1328_v15 = vrot.slane %v3728_v33, 5 }
  0x9b   : > { %v3077_v16 = vpack.i.bf16 %v1261_v23, %v1260_v48  ;;  %v1259_v25 = vunpack.c.l.bf16 %v1161_v47  ;;  %v415_v34 = vrot.slane %v414_v27, 4  ;;  %v424_v32 = vor.u32 %v423_v42, %v419_v13  ;;  %v3800_v48 = vpop.permute.xlu1 %2873 }
  0x9c   : > { %v1329_v7 = vsel %vm3364_vm2, %v2621_v36, %v1328_v15  ;;  %v1330_v38 = vrot.slane %v1328_v15, 4  ;;  %v1331_v24 = vrot.slane %v3739_v44, 5  ;;  %v432_v40 = vshrl.u32 %v234_v28, 16 }
  0x9d   : > { %3078 = vrot.lane.b32.xlu1 %v3077_v16, %s3241_s4  ;;  %v3072_v33 = vpack.i.bf16 %v1259_v25, %v1258_v18  ;;  %v420_v6 = vsel %vm3408_vm5, %v415_v34, %v419_v13  ;;  %v425_v10 = vrot.slane %v424_v32, 4  ;;  %v1378_v43 = vunpack.c.l.bf16 %v1329_v7  ;;  %v2557_v32 = vld [vmem:[%s3302_s24 + $0x60] sm:$0xf] }
  0x9e   : > { %v483_v50 = vunpack.c.l.bf16 %v420_v6  ;;  %v1332_v19 = vsel %vm3364_vm2, %v1330_v38, %v1331_v24  ;;  %v434_v30 = vrot.slane %v432_v40, 4  ;;  %v435_v44 = vshll.u32 %v234_v28, 16 }
  0x9f   : > { %3073 = vrot.lane.b32.xlu0 %v3072_v33, %s3241_s4  ;;  %v430_v51 = vsel %vm3408_vm5, %v425_v10, %v429_v29  ;;  %v1379_v20 = vunpack.c.l.bf16 %v1332_v19  ;;  %v441_v52 = vshll.u32 %v3782_v39, 16  ;;  %v445_v4 = vshrl.u32 %v3782_v39, 16  ;;  %v3821_v7 = vpop.permute.xlu1 %2878 }
  0xa0   : > { %v484_v35 = vunpack.c.l.bf16 %v430_v51  ;;  %v437_v56 = vrot.slane %v435_v44, 5  ;;  %v451_v31 = vshll.u32 %v259_v46, 16  ;;  %v2622_v55 = vrot.slane %v2614_v49, 9  ;;  %v2555_v51 = vld [vmem:[%s3302_s24 + $0x54] sm:$0xf] }
  0xa1   : > { %v3082_v59 = vpack.i.bf16 %v1379_v20, %v1378_v43  ;;  %v443_v60 = vrot.slane %v441_v52, 5  ;;  %v447_v61 = vrot.slane %v445_v4, 4  ;;  %v1335_v63 = vrot.slane %v3721_v41, 5  ;;  %v3832_v20 = vld [vmem:[%s3302_s24 + $0x58] sm:$0xf] }
  0xa2   : > { %v3087_v53 = vpack.i.bf16 %v484_v35, %v483_v50  ;;  %v438_v5 = vor.u32 %v437_v56, %v434_v30  ;;  %v453_v8 = vrot.slane %v451_v31, 5  ;;  %v1338_v9 = vrot.slane %v3733_v1, 5 }
  0xa3   : > { %3083 = vrot.lane.b32.xlu0 %v3082_v59, %s3242_s7  ;;  %v448_v12 = vor.u32 %v447_v61, %v443_v60  ;;  %v1336_v14 = vsel %vm3364_vm2, %v2622_v55, %v1335_v63  ;;  %v1337_v17 = vrot.slane %v1335_v63, 4  ;;  %v2540_v3 = vrot.slane %v494_v58, 9 }
  0xa4   : > { %3088 = vrot.lane.b32.xlu1 %v3087_v53, %s3239_s29  ;;  %v439_v41 = vrot.slane %v438_v5, 4  ;;  %v1380_v18 = vunpack.c.l.bf16 %v1336_v14  ;;  %v573_v22 = vrot.slane %v3782_v39, 5  ;;  %v576_v23 = vrot.slane %v259_v46, 5  ;;  %v2558_v46 = vld [vmem:[%s3302_s24 + $0x64] sm:$0xf]  ;;  %v3839_v5 = vpop.permute.xlu1 %2888 }
  0xa5   : > { %v449_v27 = vrot.slane %v448_v12, 4  ;;  %v1339_v1 = vsel %vm3364_vm2, %v1337_v17, %v1338_v9  ;;  %v2539_v13 = vrot.slane %v493_v11, 9  ;;  %v566_v42 = vrot.slane %v3749_v57, 5  ;;  %v3823_v57 = vpop.permute.xlu0 %2893  ;;  %v2565_v17 = vld [vmem:[%s3302_s24 + $0x5c] sm:$0x1] }
  0xa6   : > { %v444_v28 = vsel %vm3408_vm5, %v439_v41, %v443_v60  ;;  %v1381_v47 = vunpack.c.l.bf16 %v1339_v1  ;;  %v574_v29 = vsel %vm3364_vm2, %v2540_v3, %v573_v22  ;;  %v575_v36 = vrot.slane %v573_v22, 4  ;;  %v2574_v3 = vld [vmem:[%s3302_s24 + $0x60] sm:$0xe] }
  0xa7   : > { %v454_v15 = vsel %vm3408_vm5, %v449_v27, %v453_v8  ;;  %v485_v16 = vunpack.c.l.bf16 %v444_v28  ;;  %v608_v25 = vunpack.c.l.bf16 %v574_v29  ;;  %v567_v34 = vsel %vm3364_vm2, %v2539_v13, %v566_v42 }
  0xa8   : > { %v486_v38 = vunpack.c.l.bf16 %v454_v15  ;;  %v3092_v24 = vpack.i.bf16 %v1381_v47, %v1380_v18  ;;  %v577_v40 = vsel %vm3364_vm2, %v575_v36, %v576_v23  ;;  %v568_v33 = vrot.slane %v566_v42, 4 }
  0xa9   : > { %v609_v6 = vunpack.c.l.bf16 %v577_v40  ;;  %v569_v10 = vrot.slane %v3754_v62, 5  ;;  %v606_v43 = vunpack.c.l.bf16 %v567_v34  ;;  %v644_v49 = vunpack.c.l.bf16 %v2557_v32  ;;  %v2566_v62 = vld [vmem:[%s3302_s24 + $0x68] sm:$0x1] }
  0xaa   : > { %v3097_v50 = vpack.i.bf16 %v486_v38, %v485_v16  ;;  %3093 = vrot.lane.b32.xlu0 %v3092_v24, %s3242_s7  ;;  %v645_v19 = vunpack.c.l.bf16 %v2558_v46  ;;  %v823_v30 = vshrl.u32 %v2557_v32, 16  ;;  %v826_v44 = vshll.u32 %v2557_v32, 16  ;;  %v3841_v8 = vpop.permute.xlu0 %2898  ;;  %v2573_v32 = vld [vmem:[%s3302_s24 + $0x54] sm:$0xe] }
  0xab   : > { %v3107_v52 = vpack.i.bf16 %v609_v6, %v608_v25  ;;  %v570_v4 = vsel %vm3364_vm2, %v568_v33, %v569_v10  ;;  %v642_v35 = vunpack.c.l.bf16 %v2555_v51  ;;  %v643_v56 = vunpack.c.l.bf16 %v3832_v20 }
  0xac   : > { %3098 = vrot.lane.b32.xlu1 %v3097_v50, %s3239_s29  ;;  %v607_v31 = vunpack.c.l.bf16 %v570_v4  ;;  %v825_v55 = vrot.slane %v823_v30, 4  ;;  %v828_v58 = vrot.slane %v826_v44, 5  ;;  %v3117_v59 = vpack.i.bf16 %v645_v19, %v644_v49 }
  0xad   : > { %v799_v60 = vshrl.u32 %v2555_v51, 16  ;;  %v802_v61 = vshll.u32 %v2555_v51, 16  ;;  %v3112_v63 = vpack.i.bf16 %v643_v56, %v642_v35  ;;  %v832_v53 = vshll.u32 %v2558_v46, 16 }
  0xae   : > { %v3102_v9 = vpack.i.bf16 %v607_v31, %v606_v43  ;;  %v829_v11 = vor.u32 %v828_v58, %v825_v55  ;;  %v836_v12 = vshrl.u32 %v2558_v46, 16  ;;  %v842_v14 = vshll.u32 %v2566_v62, 16  ;;  %v3852_v6 = vpop.permute.xlu1 %2908 }
  0xaf   : > { %v801_v41 = vrot.slane %v799_v60, 4  ;;  %v804_v18 = vrot.slane %v802_v61, 5  ;;  %v834_v22 = vrot.slane %v832_v53, 5  ;;  %v808_v23 = vshll.u32 %v3832_v20, 16  ;;  %v3854_v10 = vpop.permute.xlu0 %2903 }
  0xb0   : > { %3108 = vrot.lane.b32.xlu1 %v3107_v52, %s3238_s28  ;;  %3103 = vrot.lane.b32.xlu0 %v3102_v9, %s3238_s28  ;;  %v830_v27 = vrot.slane %v829_v11, 4  ;;  %v838_v1 = vrot.slane %v836_v12, 4  ;;  %v844_v13 = vrot.slane %v842_v14, 5  ;;  %v812_v42 = vshrl.u32 %v3832_v20, 16  ;;  %v2597_v9 = vld [vmem:[%s3302_s24 + $0x60] sm:$0xf] }
  0xb1   : > { %v805_v28 = vor.u32 %v804_v18, %v801_v41  ;;  %v810_v47 = vrot.slane %v808_v23, 5  ;;  %v818_v29 = vshll.u32 %v2565_v17, 16  ;;  %v2582_v36 = vrot.slane %v2574_v3, 9  ;;  %v3880_v41 = vld [vmem:[%s3302_s24 + $0x70] sm:$0xf] }
  0xb2   : > { %v835_v15 = vsel %vm3408_vm5, %v830_v27, %v834_v22  ;;  %v839_v16 = vor.u32 %v838_v1, %v834_v22  ;;  %v814_v25 = vrot.slane %v812_v42, 4  ;;  %v961_v34 = vrot.slane %v2558_v46, 5  ;;  %v3885_v1 = vld [vmem:[%s3302_s24 + $0x64] sm:$0xf] }
  0xb3   : > { %v876_v38 = vunpack.c.l.bf16 %v835_v15  ;;  %v806_v24 = vrot.slane %v805_v28, 4  ;;  %v820_v40 = vrot.slane %v818_v29, 5  ;;  %v964_v33 = vrot.slane %v2566_v62, 5 }
  0xb4   : > { %3118 = vrot.lane.b32.xlu1 %v3117_v59, %s3235_s25  ;;  %3113 = vrot.lane.b32.xlu0 %v3112_v63, %s3235_s25  ;;  %v840_v43 = vrot.slane %v839_v16, 4  ;;  %v815_v49 = vor.u32 %v814_v25, %v810_v47  ;;  %v962_v50 = vsel %vm3364_vm2, %v2582_v36, %v961_v34  ;;  %v963_v46 = vrot.slane %v961_v34, 4  ;;  %v3890_v16 = vld [vmem:[%s3302_s24 + $0x74] sm:$0x1]  ;;  %s2526_s25 = sshll.u32 %s4270_s13, 5 }
  0xb5   : > { %v811_v19 = vsel %vm3408_vm5, %v806_v24, %v810_v47  ;;  %v996_v30 = vunpack.c.l.bf16 %v962_v50  ;;  %v2581_v44 = vrot.slane %v2573_v32, 9  ;;  %v954_v51 = vrot.slane %v3832_v20, 5  ;;  %v2599_v20 = vld [vmem:[%s3302_s24 + $0x6c] sm:$0xf]  ;;  %v3873_v11 = vpop.permute.xlu1 %2918 }
  0xb6   : > { %v845_v52 = vsel %vm3408_vm5, %v840_v43, %v844_v13  ;;  %v816_v4 = vrot.slane %v815_v49, 4  ;;  %v874_v35 = vunpack.c.l.bf16 %v811_v19  ;;  %v965_v56 = vsel %vm3364_vm2, %v963_v46, %v964_v33 }
  0xb7   : > { %v877_v62 = vunpack.c.l.bf16 %v845_v52  ;;  %v997_v31 = vunpack.c.l.bf16 %v965_v56  ;;  %v955_v55 = vsel %vm3364_vm2, %v2581_v44, %v954_v51  ;;  %v956_v58 = vrot.slane %v954_v51, 4 }
  0xb8   : > { %v821_v59 = vsel %vm3408_vm5, %v816_v4, %v820_v40  ;;  %v957_v60 = vrot.slane %v2565_v17, 5  ;;  %v994_v53 = vunpack.c.l.bf16 %v955_v55  ;;  %v1032_v18 = vunpack.c.l.bf16 %v2599_v20 }
  0xb9   : > { %v3127_v61 = vpack.i.bf16 %v877_v62, %v876_v38  ;;  %v875_v63 = vunpack.c.l.bf16 %v821_v59  ;;  %v3875_v12 = vpop.permute.xlu0 %2913  ;;  %v3137_v14 = vpack.i.bf16 %v997_v31, %v996_v30  ;;  %v1033_v23 = vunpack.c.l.bf16 %v3880_v41  ;;  %v3895_v38 = vld [vmem:[%s3302_s24 + $0x68] sm:$0x1] }
  0xba   : > { %v958_v3 = vsel %vm3364_vm2, %v956_v58, %v957_v60  ;;  %v1211_v27 = vshrl.u32 %v2599_v20, 16  ;;  %v1214_v13 = vshll.u32 %v2599_v20, 16  ;;  %v1030_v42 = vunpack.c.l.bf16 %v2597_v9  ;;  %v2616_v60 = vld [vmem:[%s3302_s24 + $0x6c] sm:$0xe] }
  0xbb   : > { %3128 = vrot.lane.b32.xlu1 %v3127_v61, %s3240_s30  ;;  %v3122_v17 = vpack.i.bf16 %v875_v63, %v874_v35  ;;  %v995_v22 = vunpack.c.l.bf16 %v958_v3  ;;  %v1031_v28 = vunpack.c.l.bf16 %v3885_v1  ;;  %v1187_v47 = vshrl.u32 %v2597_v9, 16 }
  0xbc   : > { %v1213_v36 = vrot.slane %v1211_v27, 4  ;;  %v1190_v15 = vshll.u32 %v2597_v9, 16  ;;  %v1216_v34 = vrot.slane %v1214_v13, 5  ;;  %v3147_v24 = vpack.i.bf16 %v1033_v23, %v1032_v18  ;;  %v3898_v43 = vpop.permute.xlu1 %2928 }
  0xbd   : > { %3123 = vrot.lane.b32.xlu0 %v3122_v17, %s3240_s30  ;;  %v3132_v29 = vpack.i.bf16 %v995_v22, %v994_v53  ;;  %v3892_v25 = vpop.permute.xlu0 %2923  ;;  %v1189_v32 = vrot.slane %v1187_v47, 4  ;;  %v3142_v33 = vpack.i.bf16 %v1031_v28, %v1030_v42  ;;  %v1220_v50 = vshll.u32 %v3880_v41, 16 }
  0xbe   : > { %v1192_v40 = vrot.slane %v1190_v15, 5  ;;  %v1217_v49 = vor.u32 %v1216_v34, %v1213_v36  ;;  %v1224_v46 = vshrl.u32 %v3880_v41, 16  ;;  %v1230_v19 = vshll.u32 %v3890_v16, 16 }
  0xbf   : > { %3138 = vrot.lane.b32.xlu1 %v3137_v14, %s3237_s27  ;;  %v1196_v44 = vshll.u32 %v3885_v1, 16  ;;  %v1200_v51 = vshrl.u32 %v3885_v1, 16  ;;  %v1206_v52 = vshll.u32 %v3895_v38, 16  ;;  %v2861_v4 = vunpack.i.h.bf16 %v3756_v26  ;;  %v2615_v14 = vld [vmem:[%s3302_s24 + $0x60] sm:$0xe] }
  0xc0   : > { %v1193_v30 = vor.u32 %v1192_v40, %v1189_v32  ;;  %v1218_v35 = vrot.slane %v1217_v49, 4  ;;  %v1222_v56 = vrot.slane %v1220_v50, 5  ;;  %v1226_v62 = vrot.slane %v1224_v46, 4 }
  0xc1   : > { %3133 = vrot.lane.b32.xlu0 %v3132_v29, %s3237_s27  ;;  %v2860_v31 = vunpack.i.l.bf16 %v3756_v26  ;;  %v1198_v58 = vrot.slane %v1196_v44, 5  ;;  %v1202_v59 = vrot.slane %v1200_v51, 4  ;;  %v2856_v61 = vunpack.i.h.bf16 %v3758_v0 }
  0xc2   : > { %v1194_v55 = vrot.slane %v1193_v30, 4  ;;  %v3911_v20 = vpop.permute.xlu0 %2933  ;;  %v1223_v63 = vsel %vm3408_vm5, %v1218_v35, %v1222_v56  ;;  %v1227_v53 = vor.u32 %v1226_v62, %v1222_v56  ;;  %v1232_v9 = vrot.slane %v1230_v19, 5 }
  0xc3   : > { %3148 = vrot.lane.b32.xlu1 %v3147_v24, %s3236_s26  ;;  %v2855_v3 = vunpack.i.l.bf16 %v3758_v0  ;;  %v1203_v17 = vor.u32 %v1202_v59, %v1198_v58  ;;  %v1208_v22 = vrot.slane %v1206_v52, 5  ;;  %v2871_v27 = vunpack.i.h.bf16 %v3774_v37 }
  0xc4   : > { %v1199_v18 = vsel %vm3408_vm5, %v1194_v55, %v1198_v58  ;;  %v1228_v13 = vrot.slane %v1227_v53, 4  ;;  %v1264_v42 = vunpack.c.l.bf16 %v1223_v63  ;;  %v2624_v28 = vrot.slane %v2616_v60, 9  ;;  %v3180_v55 = vld [vmem:[%s3302_s24 + $0x4] sm:$0xf] }
  0xc5   : > { %3143 = vrot.lane.b32.xlu0 %v3142_v33, %s3236_s26  ;;  %v3921_v23 = vpop.permute.xlu1 %2938  ;;  %v1204_v47 = vrot.slane %v1203_v17, 4  ;;  %v1349_v29 = vrot.slane %v3880_v41, 5  ;;  %v1352_v36 = vrot.slane %v3890_v16, 5  ;;  %v2623_v15 = vrot.slane %v2615_v14, 9  ;;  %v3181_v14 = vld [vmem:[%s3302_s24] sm:$0xf] }
  0xc6   : > { %v1233_v34 = vsel %vm3408_vm5, %v1228_v13, %v1232_v9  ;;  %v1262_v32 = vunpack.c.l.bf16 %v1199_v18  ;;  %v1342_v24 = vrot.slane %v3885_v1, 5  ;;  %v1345_v40 = vrot.slane %v3895_v38, 5  ;;  %v3182_v13 = vld [vmem:[%s3302_s24 + $0xc] sm:$0xf] }
  0xc7   : > { %v1265_v33 = vunpack.c.l.bf16 %v1233_v34  ;;  %v1209_v49 = vsel %vm3408_vm5, %v1204_v47, %v1208_v22  ;;  %v1350_v50 = vsel %vm3364_vm2, %v2624_v28, %v1349_v29  ;;  %v1351_v41 = vrot.slane %v1349_v29, 4 }
  0xc8   : > { %v3936_v16 = vpop.permute.xlu0 %2943  ;;  %v1263_v19 = vunpack.c.l.bf16 %v1209_v49  ;;  %v1384_v30 = vunpack.c.l.bf16 %v1350_v50  ;;  %v1343_v1 = vsel %vm3364_vm2, %v2623_v15, %v1342_v24  ;;  %v1344_v44 = vrot.slane %v1342_v24, 4 }
  0xc9   : > { %v3934_v46 = vpop.permute.xlu1 %2948  ;;  %v3157_v38 = vpack.i.bf16 %v1265_v33, %v1264_v42  ;;  %v2876_v51 = vunpack.i.h.bf16 %v3800_v48  ;;  %v1353_v54 = vsel %vm3364_vm2, %v1351_v41, %v1352_v36  ;;  %v1382_v52 = vunpack.c.l.bf16 %v1343_v1  ;;  %v3183_v36 = vld [vmem:[%s3302_s24 + $0x10] sm:$0xf] }
  0xca   : > { %v3152_v35 = vpack.i.bf16 %v1263_v19, %v1262_v32  ;;  %v1385_v56 = vunpack.c.l.bf16 %v1353_v54  ;;  %v1346_v62 = vsel %vm3364_vm2, %v1344_v44, %v1345_v40  ;;  %v237_v58 = vunpack.c.l.bf16 %v3180_v55 }
  0xcb   : > { %3158 = vrot.lane.b32.xlu1 %v3157_v38, %s3241_s4  ;;  %v2875_v59 = vunpack.i.l.bf16 %v3800_v48  ;;  %v1383_v60 = vunpack.c.l.bf16 %v1346_v62  ;;  %v2896_v63 = vunpack.i.h.bf16 %v3823_v57  ;;  %v2895_v45 = vunpack.i.l.bf16 %v3823_v57 }
  0xcc   : > { %3153 = vrot.lane.b32.xlu0 %v3152_v35, %s3241_s4  ;;  %v3167_v9 = vpack.i.bf16 %v1385_v56, %v1384_v30  ;;  %v236_v18 = vunpack.c.l.bf16 %v3181_v14  ;;  %v2881_v22 = vunpack.i.h.bf16 %v3821_v7  ;;  %v238_v42 = vunpack.c.l.bf16 %v3182_v13  ;;  %v3957_v28 = vpop.permute.xlu0 %2953  ;;  %s2528_s4 = sshll.u32 %s4270_s13, 1 }
  0xcd   : > { %v3949_v53 = vpop.permute.xlu1 %2958  ;;  %v3162_v17 = vpack.i.bf16 %v1383_v60, %v1382_v52  ;;  %v1900_v48 = vsel %vm1898_vm6, %v237_v58, %v2896_v63  ;;  %v2880_v47 = vunpack.i.l.bf16 %v3821_v7  ;;  %v239_v15 = vunpack.c.l.bf16 %v3183_v36 }
  0xce   : > { %v1899_v29 = vsel %vm1898_vm6, %v236_v18, %v2895_v45  ;;  %v2901_v34 = vunpack.i.h.bf16 %v3841_v8  ;;  %v1917_v57 = vsel %vm1915_vm7, %v1900_v48, %v2876_v51  ;;  %v2900_v24 = vunpack.i.l.bf16 %v3841_v8  ;;  %v3184_v18 = vld [vmem:[%s3302_s24 + $0x18] sm:$0xf] }
  0xcf   : > { %3168 = vrot.lane.b32.xlu1 %v3167_v9, %s3242_s7  ;;  %v1916_v32 = vsel %vm1915_vm7, %v1899_v29, %v2875_v59  ;;  %v2911_v7 = vunpack.i.h.bf16 %v3852_v6  ;;  %v2910_v33 = vunpack.i.l.bf16 %v3852_v6  ;;  %v2905_v41 = vunpack.i.l.bf16 %v3854_v10 }
  0xd0   : > { %3163 = vrot.lane.b32.xlu0 %v3162_v17, %s3242_s7  ;;  %v1902_v40 = vsel %vm1898_vm6, %v239_v15, %v2901_v34  ;;  %v1901_v50 = vsel %vm1898_vm6, %v238_v42, %v2900_v24  ;;  %v2891_v8 = vunpack.i.h.bf16 %v3839_v5  ;;  %v2906_v44 = vunpack.i.h.bf16 %v3854_v10 }
  0xd1   : > { %v1919_v49 = vsel %vm1915_vm7, %v1902_v40, %v2881_v22  ;;  %v1918_v30 = vsel %vm1915_vm7, %v1901_v50, %v2880_v47  ;;  %v2870_v6 = vunpack.i.l.bf16 %v3774_v37  ;;  %v2890_v38 = vunpack.i.l.bf16 %v3839_v5  ;;  %v3185_v22 = vld [vmem:[%s3302_s24 + $0x1c] sm:$0xf] }
  0xd2   : > { %v3974_v19 = vpop.permute.xlu1 %2968  ;;  %v1936_v1 = vsel %vm1932_vm8, %v1919_v49, %v2861_v4  ;;  %v1935_v51 = vsel %vm1932_vm8, %v1918_v30, %v2860_v31  ;;  %v1933_v10 = vsel %vm1932_vm8, %v1916_v32, %v2855_v3  ;;  %v1934_v5 = vsel %vm1932_vm8, %v1917_v57, %v2856_v61 }
  0xd3   : > { %v1953_v54 = vsel %vm1949_vm9, %v1936_v1, %v2911_v7  ;;  %v1952_v35 = vsel %vm1949_vm9, %v1935_v51, %v2910_v33  ;;  %v1950_v4 = vsel %vm1949_vm9, %v1933_v10, %v2905_v41  ;;  %v2921_v31 = vunpack.i.h.bf16 %v3873_v11  ;;  %v3186_v7 = vld [vmem:[%s3302_s24 + $0x24] sm:$0xf] }
  0xd4   : > { %v1970_v56 = vsel %vm1966_vm10, %v1953_v54, %v2891_v8  ;;  %v1969_v26 = vsel %vm1966_vm10, %v1952_v35, %v2890_v38  ;;  %v2885_v62 = vunpack.i.l.bf16 %v3798_v2  ;;  %v1951_v55 = vsel %vm1949_vm9, %v1934_v5, %v2906_v44  ;;  %v3187_v8 = vld [vmem:[%s3302_s24 + $0x28] sm:$0xf] }
  0xd5   : > { %v3988_v52 = vpop.permute.xlu0 %2963  ;;  %v1987_v3 = vsel %vm1983_vm11, %v1970_v56, %v2871_v27  ;;  %v2866_v0 = vunpack.i.h.bf16 %v3776_v21  ;;  %v2886_v61 = vunpack.i.h.bf16 %v3798_v2  ;;  %v2920_v58 = vunpack.i.l.bf16 %v3873_v11 }
  0xd6   : > { %v4009_v59 = vpop.permute.xlu1 %2978  ;;  %v2865_v63 = vunpack.i.l.bf16 %v3776_v21  ;;  %v1967_v9 = vsel %vm1966_vm10, %v1950_v4, %v2885_v62  ;;  %v1986_v45 = vsel %vm1983_vm11, %v1969_v26, %v2870_v6  ;;  %v2915_v37 = vunpack.i.l.bf16 %v3875_v12 }
  0xd7   : > { %v1968_v27 = vsel %vm1966_vm10, %v1951_v55, %v2886_v61  ;;  %v2004_v14 = vsel %vm2000_vm12, %v1987_v3, %v2921_v31  ;;  %v2916_v2 = vunpack.i.h.bf16 %v3875_v12  ;;  %v2925_v11 = vunpack.i.l.bf16 %v3892_v25 }
  0xd8   : > { %v240_v17 = vunpack.c.l.bf16 %v3184_v18  ;;  %v241_v48 = vunpack.c.l.bf16 %v3185_v22  ;;  %v2926_v21 = vunpack.i.h.bf16 %v3892_v25  ;;  %v2003_v13 = vsel %vm2000_vm12, %v1986_v45, %v2920_v58 }
  0xd9   : > { %v4011_v60 = vpop.permute.xlu0 %2973  ;;  %v2936_v42 = vunpack.i.h.bf16 %v3911_v20  ;;  %v2935_v47 = vunpack.i.l.bf16 %v3911_v20  ;;  %v1984_v29 = vsel %vm1983_vm11, %v1967_v9, %v2865_v63  ;;  %v2931_v12 = vunpack.i.h.bf16 %v3898_v43 }
  0xda   : > { %v1985_v36 = vsel %vm1983_vm11, %v1968_v27, %v2866_v0  ;;  %v2001_v15 = vsel %vm2000_vm12, %v1984_v29, %v2915_v37  ;;  %v4035_v24 = vpop.permute.xlu1 %2988  ;;  %v2930_v40 = vunpack.i.l.bf16 %v3898_v43  ;;  %v242_v33 = vunpack.c.l.bf16 %v3186_v7 }
  0xdb   : > { %v2020_v25 = vsel %vm2017_vm13, %v2003_v13, %v2935_v47  ;;  %v2021_v34 = vsel %vm2017_vm13, %v2004_v14, %v2936_v42  ;;  %v2002_v57 = vsel %vm2000_vm12, %v1985_v36, %v2916_v2  ;;  %v2018_v32 = vsel %vm2017_vm13, %v2001_v15, %v2925_v11 }
  0xdc   : > { %v2637_v49 = vpack.c.bf16 %v2021_v34, %v2020_v25  ;;  %v2019_v50 = vsel %vm2017_vm13, %v2002_v57, %v2926_v21  ;;  %v243_v30 = vunpack.c.l.bf16 %v3187_v8  ;;  %v2941_v1 = vunpack.i.h.bf16 %v3921_v23 }
  0xdd   : > { %v4037_v20 = vpop.permute.xlu0 %2983  ;;  %v2940_v44 = vunpack.i.l.bf16 %v3921_v23  ;;  %v2634_v6 = vpack.c.bf16 %v2019_v50, %v2018_v32  ;;  %v2951_v38 = vunpack.i.h.bf16 %v3934_v46  ;;  %v2950_v43 = vunpack.i.l.bf16 %v3934_v46 }
  0xde   : > { %v2946_v51 = vunpack.i.h.bf16 %v3936_v16  ;;  %v2945_v54 = vunpack.i.l.bf16 %v3936_v16  ;;  %v2961_v35 = vunpack.i.h.bf16 %v3949_v53  ;;  %v1904_v56 = vsel %vm1898_vm6, %v241_v48, %v2931_v12 }
  0xdf   : > { %2771 = vmatprep.mubr.msk.bf16.mxu0 %vm4042_vm15, %v2634_v6  ;;  %v1903_v10 = vsel %vm1898_vm6, %v240_v17, %v2930_v40  ;;  %v2960_v23 = vunpack.i.l.bf16 %v3949_v53  ;;  %v1906_v46 = vsel %vm1898_vm6, %v243_v30, %v2941_v1  ;;  %v1905_v5 = vsel %vm1898_vm6, %v242_v33, %v2940_v44 }
  0xe0   : > { %2772 = vmatmul.mubr.msk.bf16.vlgmr.msra.gmra.mrb[0].mxu0 %vm4042_vm15, %v2637_v49  ;;  %v2956_v26 = vunpack.i.h.bf16 %v3957_v28  ;;  %v2955_v4 = vunpack.i.l.bf16 %v3957_v28  ;;  %v1922_v62 = vsel %vm1915_vm7, %v1905_v5, %v2950_v43  ;;  %v1923_v55 = vsel %vm1915_vm7, %v1906_v46, %v2951_v38 }
  0xe1   : > { %v1921_v3 = vsel %vm1915_vm7, %v1904_v56, %v2946_v51  ;;  %v2970_v0 = vunpack.i.l.bf16 %v3974_v19  ;;  %v1920_v53 = vsel %vm1915_vm7, %v1903_v10, %v2945_v54  ;;  %v1940_v61 = vsel %vm1932_vm8, %v1923_v55, %v2961_v35 }
  0xe2   : > { %v2999_v16 = vpop.permute.xlu1 %2998  ;;  %v2966_v58 = vunpack.i.h.bf16 %v3988_v52  ;;  %v2965_v63 = vunpack.i.l.bf16 %v3988_v52  ;;  %v1939_v28 = vsel %vm1932_vm8, %v1922_v62, %v2960_v23  ;;  %v2971_v9 = vunpack.i.h.bf16 %v3974_v19  ;;  %v3188_v62 = vld [vmem:[%s3302_s24 + $0x34] sm:$0xf] }
  0xe3   : > { %v2976_v45 = vunpack.i.h.bf16 %v4011_v60  ;;  %v2975_v37 = vunpack.i.l.bf16 %v4011_v60  ;;  %v1937_v27 = vsel %vm1932_vm8, %v1920_v53, %v2955_v4  ;;  %v1938_v14 = vsel %vm1932_vm8, %v1921_v3, %v2956_v26  ;;  %v3189_v53 = vld [vmem:[%s3302_s24 + $0x30] sm:$0xf] }
  0xe4   : > { %v2981_v2 = vunpack.i.h.bf16 %v4009_v59  ;;  %v2986_v11 = vunpack.i.h.bf16 %v4037_v20  ;;  %v1956_v17 = vsel %vm1949_vm9, %v1939_v28, %v2970_v0  ;;  %v2980_v52 = vunpack.i.l.bf16 %v4009_v59  ;;  %v3190_v28 = vld [vmem:[%s3302_s24 + $0x3c] sm:$0xf] }
  0xe5   : > { %v2994_v31 = vpop.permute.xlu0 %2993  ;;  %v2985_v22 = vunpack.i.l.bf16 %v4037_v20  ;;  %v1954_v48 = vsel %vm1949_vm9, %v1937_v27, %v2965_v63  ;;  %v1955_v60 = vsel %vm1949_vm9, %v1938_v14, %v2966_v58  ;;  %v2990_v21 = vunpack.i.l.bf16 %v4035_v24 }
  0xe6   : > { %v2996_v19 = vunpack.i.h.bf16 %v2994_v31  ;;  %v2995_v13 = vunpack.i.l.bf16 %v2994_v31  ;;  %v1957_v47 = vsel %vm1949_vm9, %v1940_v61, %v2971_v9  ;;  %v1971_v29 = vsel %vm1966_vm10, %v1954_v48, %v2975_v37 }
  0xe7   : > { %v1972_v12 = vsel %vm1966_vm10, %v1955_v60, %v2976_v45  ;;  %v2991_v36 = vunpack.i.h.bf16 %v4035_v24  ;;  %v3001_v15 = vunpack.i.h.bf16 %v2999_v16  ;;  %v3000_v25 = vunpack.i.l.bf16 %v2999_v16  ;;  %v3191_v45 = vld [vmem:[%s3302_s24 + $0x40] sm:$0xf] }
  0xe8   : > { %v1989_v59 = vsel %vm1983_vm11, %v1972_v12, %v2986_v11  ;;  %v1973_v57 = vsel %vm1966_vm10, %v1956_v17, %v2980_v52  ;;  %v1988_v32 = vsel %vm1983_vm11, %v1971_v29, %v2985_v22  ;;  %v1974_v7 = vsel %vm1966_vm10, %v1957_v47, %v2981_v2 }
  0xe9   : > { %v3004_v18 = vpop.permute.xlu0 %3003  ;;  %v3009_v42 = vpop.permute.xlu1 %3008  ;;  %v2006_v20 = vsel %vm2000_vm12, %v1989_v59, %v2996_v19  ;;  %v1990_v33 = vsel %vm1983_vm11, %v1973_v57, %v2990_v21  ;;  %v2005_v49 = vsel %vm2000_vm12, %v1988_v32, %v2995_v13  ;;  %v1991_v8 = vsel %vm1983_vm11, %v1974_v7, %v2991_v36 }
  0xea   : > { %v3006_v34 = vunpack.i.h.bf16 %v3004_v18  ;;  %v3005_v40 = vunpack.i.l.bf16 %v3004_v18  ;;  %v2007_v6 = vsel %vm2000_vm12, %v1990_v33, %v3000_v25  ;;  %v2008_v38 = vsel %vm2000_vm12, %v1991_v8, %v3001_v15 }
  0xeb   : > { %v245_v55 = vunpack.c.l.bf16 %v3188_v62  ;;  %v3011_v3 = vunpack.i.h.bf16 %v3009_v42  ;;  %v244_v61 = vunpack.c.l.bf16 %v3189_v53  ;;  %v3010_v58 = vunpack.i.l.bf16 %v3009_v42 }
  0xec   : > { %v2023_v24 = vsel %vm2017_vm13, %v2006_v20, %v3006_v34  ;;  %v2022_v30 = vsel %vm2017_vm13, %v2005_v49, %v3005_v40  ;;  %v246_v9 = vunpack.c.l.bf16 %v3190_v28  ;;  %v247_v37 = vunpack.c.l.bf16 %v3191_v45 }
  0xed   : > { %v2640_v43 = vpack.c.bf16 %v2023_v24, %v2022_v30  ;;  %v1908_v18 = vsel %vm1898_vm6, %v245_v55, %v3011_v3  ;;  %v1907_v22 = vsel %vm1898_vm6, %v244_v61, %v3010_v58 }
  0xef   : > { %v3014_v50 = vpop.permute.xlu0 %3013  ;;  %2775 = vmatprep.mubr.msk.bf16.mxu0 %vm4042_vm15, %v2640_v43 }
  0xf0   : > { %v3016_v1 = vunpack.i.h.bf16 %v3014_v50  ;;  %v3015_v44 = vunpack.i.l.bf16 %v3014_v50 }
  0xf1   : > { %v3019_v51 = vpop.permute.xlu1 %3018 }
  0xf2   : > { %v2025_v54 = vsel %vm2017_vm13, %v2008_v38, %v3016_v1  ;;  %v2024_v35 = vsel %vm2017_vm13, %v2007_v6, %v3015_v44  ;;  %v3021_v27 = vunpack.i.h.bf16 %v3019_v51  ;;  %v3020_v14 = vunpack.i.l.bf16 %v3019_v51 }
  0xf3   : > { %v2643_v56 = vpack.c.bf16 %v2025_v54, %v2024_v35 }
  0xf4   : > { %v1910_v21 = vsel %vm1898_vm6, %v247_v37, %v3021_v27  ;;  %v1909_v13 = vsel %vm1898_vm6, %v246_v9, %v3020_v14 }
  0xf5   : > { %v4107_v10 = vpop.permute.xlu1 %3028  ;;  %2776 = vmatmul.mubr.msk.bf16.gmra.mrb[4].mxu0 %vm4042_vm15, %v2643_v56  ;;  %v3024_v23 = vpop.permute.xlu0 %3023 }
  0xf6   : > { %v3026_v2 = vunpack.i.h.bf16 %v3024_v23  ;;  %v3025_v11 = vunpack.i.l.bf16 %v3024_v23  ;;  %v3030_v19 = vunpack.i.l.bf16 %v4107_v10  ;;  %v3031_v40 = vunpack.i.h.bf16 %v4107_v10 }
  0xf8   : > { %v1925_v12 = vsel %vm1915_vm7, %v1908_v18, %v3026_v2  ;;  %v1924_v36 = vsel %vm1915_vm7, %v1907_v22, %v3025_v11  ;;  %v1926_v7 = vsel %vm1915_vm7, %v1909_v13, %v3030_v19 }
  0xf9   : > { %v4111_v46 = vpop.permute.xlu1 %3038  ;;  %v3034_v5 = vpop.permute.xlu0 %3033 }
  0xfa   : > { %v3036_v17 = vunpack.i.h.bf16 %v3034_v5  ;;  %v3035_v52 = vunpack.i.l.bf16 %v3034_v5  ;;  %v3041_v24 = vunpack.i.h.bf16 %v4111_v46  ;;  %v3040_v50 = vunpack.i.l.bf16 %v4111_v46 }
  0xfc   : > { %v1941_v34 = vsel %vm1932_vm8, %v1924_v36, %v3035_v52  ;;  %v1942_v57 = vsel %vm1932_vm8, %v1925_v12, %v3036_v17  ;;  %v1943_v3 = vsel %vm1932_vm8, %v1926_v7, %v3040_v50  ;;  %v3192_v12 = vld [vmem:[%s3302_s24 + $0x48] sm:$0xf] }
  0xfd   : > { %v248_v36 = vunpack.c.l.bf16 %v3192_v12 }
 0x100   : > { %v4113_v26 = vpop.permute.xlu1 %3048 }
 0x101   : > { %v3051_v51 = vunpack.i.h.bf16 %v4113_v26  ;;  %v3050_v54 = vunpack.i.l.bf16 %v4113_v26 }
 0x102   : > { %v3044_v4 = vpop.permute.xlu0 %3043 }
 0x103   : > { %v3046_v48 = vunpack.i.h.bf16 %v3044_v4  ;;  %v3045_v60 = vunpack.i.l.bf16 %v3044_v4 }
 0x104   : > { %v4115_v16 = vpop.permute.xlu1 %3058 }
 0x105   : > { %v1958_v33 = vsel %vm1949_vm9, %v1941_v34, %v3045_v60  ;;  %v1959_v49 = vsel %vm1949_vm9, %v1942_v57, %v3046_v48  ;;  %v3061_v10 = vunpack.i.h.bf16 %v4115_v16  ;;  %v3060_v23 = vunpack.i.l.bf16 %v4115_v16 }
 0x106   : > { %v3054_v31 = vpop.permute.xlu0 %3053  ;;  %v1960_v16 = vsel %vm1949_vm9, %v1943_v3, %v3050_v54  ;;  %v251_v57 = vunpack.c.l.bf16 %v3782_v39 }
 0x107   : > { %v3056_v42 = vunpack.i.h.bf16 %v3054_v31  ;;  %v3055_v47 = vunpack.i.l.bf16 %v3054_v31  ;;  %v1927_v31 = vsel %vm1915_vm7, %v1910_v21, %v3031_v40  ;;  %v1977_v28 = vsel %vm1966_vm10, %v1960_v16, %v3060_v23 }
 0x108   : > { %v4119_v63 = vpop.permute.xlu1 %3068 }
 0x109   : > { %v1975_v8 = vsel %vm1966_vm10, %v1958_v33, %v3055_v47  ;;  %v1976_v30 = vsel %vm1966_vm10, %v1959_v49, %v3056_v42  ;;  %v3071_v62 = vunpack.i.h.bf16 %v4119_v63  ;;  %v3070_v55 = vunpack.i.l.bf16 %v4119_v63 }
 0x10a   : > { %v3064_v0 = vpop.permute.xlu0 %3063 }
 0x10b   : > { %v3066_v59 = vunpack.i.h.bf16 %v3064_v0  ;;  %v3065_v15 = vunpack.i.l.bf16 %v3064_v0  ;;  %v1944_v0 = vsel %vm1932_vm8, %v1927_v31, %v3041_v24  ;;  %v1994_v63 = vsel %vm1983_vm11, %v1977_v28, %v3070_v55 }
 0x10c   : > { %v1961_v58 = vsel %vm1949_vm9, %v1944_v0, %v3051_v51 }
 0x10d   : > { %v1992_v44 = vsel %vm1983_vm11, %v1975_v8, %v3065_v15  ;;  %v1993_v6 = vsel %vm1983_vm11, %v1976_v30, %v3066_v59  ;;  %v1978_v9 = vsel %vm1966_vm10, %v1961_v58, %v3061_v10  ;;  %v3193_v59 = vld [vmem:[%s3302_s24 + $0x4c] sm:$0xf] }
 0x10e   : > { %v1995_v37 = vsel %vm1983_vm11, %v1978_v9, %v3071_v62  ;;  %v249_v15 = vunpack.c.l.bf16 %v3193_v59 }
 0x10f   : > { %v3079_v25 = vpop.permute.xlu1 %3078 }
 0x110   : > { %v3081_v53 = vunpack.i.h.bf16 %v3079_v25  ;;  %v3080_v61 = vunpack.i.l.bf16 %v3079_v25  ;;  %v3194_v25 = vld [vmem:[%s3302_s24 + $0x54] sm:$0xf]  ;;  %s2525_s24 = sshll.u32 %s3217_s12, 4  ;;  %s4274_s12 = smov (!%p209_p7, %s3217_s12), 1 }
 0x111   : > { %v3074_v29 = vpop.permute.xlu0 %3073  ;;  %v250_v34 = vunpack.c.l.bf16 %v3194_v25  ;;  %p200_p6 = scmp.lt.s32.totalorder %s2525_s24, 31  ;;  %s212_s7 = sadd.s32 %s2528_s4, %s4274_s12 }
 0x112   : > { %v3076_v32 = vunpack.i.h.bf16 %v3074_v29  ;;  %v3075_v20 = vunpack.i.l.bf16 %v3074_v29  ;;  %v2011_v2 = vsel %vm2000_vm12, %v1994_v63, %v3080_v61  ;;  %v2012_v11 = vsel %vm2000_vm12, %v1995_v37, %v3081_v53  ;;  %s2529_s11 = sshll.u32 %s212_s7, 1 }
 0x113   : > { %s4272_s24 = smov (!%p200_p6, %s2525_s24), 31  ;;  %s214_s21 = scalar_lea.vmem %s4252_s3, %s2529_s11 }
 0x114   : > { %v2009_v35 = vsel %vm2000_vm12, %v1992_v44, %v3075_v20  ;;  %v2010_v56 = vsel %vm2000_vm12, %v1993_v6, %v3076_v32  ;;  %s203_s26 = sadd.s32 %s2526_s25, %s4272_s24 }
 0x115   : > { %v3084_v1 = vpop.permute.xlu0 %3083  ;;  %s2527_s27 = sshll.u32 %s203_s26, 2 }
 0x116   : > { %v3086_v38 = vunpack.i.h.bf16 %v3084_v1  ;;  %v3085_v43 = vunpack.i.l.bf16 %v3084_v1  ;;  %v3089_v46 = vpop.permute.xlu1 %3088  ;;  %s4214_s30 = scalar_lea.vmem %s4251_s2, %s2527_s27 }
 0x117   : > { %v3091_v40 = vunpack.i.h.bf16 %v3089_v46  ;;  %v3090_v7 = vunpack.i.l.bf16 %v3089_v46 }
 0x118   : > { %v2026_v5 = vsel %vm2017_vm13, %v2009_v35, %v3085_v43  ;;  %v2027_v4 = vsel %vm2017_vm13, %v2010_v56, %v3086_v38 }
 0x119   : > { %v2646_v26 = vpack.c.bf16 %v2027_v4, %v2026_v5  ;;  %v1912_v39 = vsel %vm1898_vm6, %v249_v15, %v3091_v40  ;;  %v1911_v54 = vsel %vm1898_vm6, %v248_v36, %v3090_v7 }
 0x11b   : > { %2779 = vmatprep.mubr.msk.bf16.mxu1 %vm4042_vm15, %v2646_v26 }
 0x11c   : > { %v3094_v45 = vpop.permute.xlu0 %3093 }
 0x11d   : > { %v3096_v27 = vunpack.i.h.bf16 %v3094_v45  ;;  %v3095_v14 = vunpack.i.l.bf16 %v3094_v45 }
 0x11e   : > { %v3099_v18 = vpop.permute.xlu1 %3098 }
 0x11f   : > { %v2029_v17 = vsel %vm2017_vm13, %v2012_v11, %v3096_v27  ;;  %v2028_v52 = vsel %vm2017_vm13, %v2011_v2, %v3095_v14  ;;  %v3101_v32 = vunpack.i.h.bf16 %v3099_v18  ;;  %v3100_v20 = vunpack.i.l.bf16 %v3099_v18 }
 0x120   : > { %v2649_v22 = vpack.c.bf16 %v2029_v17, %v2028_v52 }
 0x121   : > { %v1914_v44 = vsel %vm1898_vm6, %v251_v57, %v3101_v32  ;;  %v1913_v6 = vsel %vm1898_vm6, %v250_v34, %v3100_v20 }
 0x122   : > { %v3109_v19 = vpop.permute.xlu1 %3108  ;;  %2780 = vmatmul.mubr.msk.bf16.vlgmr.msra.gmra.mrb[0].mxu1 %vm4042_vm15, %v2649_v22  ;;  %v3104_v48 = vpop.permute.xlu0 %3103 }
 0x123   : > { %v3111_v33 = vunpack.i.h.bf16 %v3109_v19  ;;  %v3110_v49 = vunpack.i.l.bf16 %v3109_v19  ;;  %v3106_v24 = vunpack.i.h.bf16 %v3104_v48  ;;  %v3105_v50 = vunpack.i.l.bf16 %v3104_v48 }
 0x125   : > { %v1930_v35 = vsel %vm1915_vm7, %v1913_v6, %v3110_v49  ;;  %v1931_v56 = vsel %vm1915_vm7, %v1914_v44, %v3111_v33  ;;  %v1929_v10 = vsel %vm1915_vm7, %v1912_v39, %v3106_v24  ;;  %v1928_v23 = vsel %vm1915_vm7, %v1911_v54, %v3105_v50 }
 0x126   : > { %v3119_v60 = vpop.permute.xlu1 %3118  ;;  %v3114_v21 = vpop.permute.xlu0 %3113 }
 0x127   : > { %v3121_v8 = vunpack.i.h.bf16 %v3119_v60  ;;  %v3120_v30 = vunpack.i.l.bf16 %v3119_v60  ;;  %v3116_v38 = vunpack.i.h.bf16 %v3114_v21  ;;  %v3115_v43 = vunpack.i.l.bf16 %v3114_v21 }
 0x129   : > { %v1947_v4 = vsel %vm1932_vm8, %v1930_v35, %v3120_v30  ;;  %v1948_v31 = vsel %vm1932_vm8, %v1931_v56, %v3121_v8  ;;  %v1945_v26 = vsel %vm1932_vm8, %v1928_v23, %v3115_v43  ;;  %v1946_v3 = vsel %vm1932_vm8, %v1929_v10, %v3116_v38 }
 0x12d   : > { %v3129_v13 = vpop.permute.xlu1 %3128 }
 0x12e   : > { %v3131_v46 = vunpack.i.h.bf16 %v3129_v13  ;;  %v3130_v5 = vunpack.i.l.bf16 %v3129_v13 }
 0x12f   : > { %v3124_v42 = vpop.permute.xlu0 %3123 }
 0x130   : > { %v3126_v62 = vunpack.i.h.bf16 %v3124_v42  ;;  %v3125_v55 = vunpack.i.l.bf16 %v3124_v42  ;;  %v1964_v45 = vsel %vm1949_vm9, %v1947_v4, %v3130_v5  ;;  %v1965_v63 = vsel %vm1949_vm9, %v1948_v31, %v3131_v46 }
 0x131   : > { %v3139_v47 = vpop.permute.xlu1 %3138 }
 0x132   : > { %v3141_v0 = vunpack.i.h.bf16 %v3139_v47  ;;  %v3140_v53 = vunpack.i.l.bf16 %v3139_v47  ;;  %v1962_v2 = vsel %vm1949_vm9, %v1945_v26, %v3125_v55  ;;  %v1963_v11 = vsel %vm1949_vm9, %v1946_v3, %v3126_v62 }
 0x133   : > { %v3134_v29 = vpop.permute.xlu0 %3133 }
 0x134   : > { %v3136_v61 = vunpack.i.h.bf16 %v3134_v29  ;;  %v3135_v16 = vunpack.i.l.bf16 %v3134_v29  ;;  %v1981_v52 = vsel %vm1966_vm10, %v1964_v45, %v3140_v53  ;;  %v1982_v22 = vsel %vm1966_vm10, %v1965_v63, %v3141_v0 }
 0x135   : > { %v3149_v1 = vpop.permute.xlu1 %3148 }
 0x136   : > { %v3151_v58 = vunpack.i.h.bf16 %v3149_v1  ;;  %v3150_v28 = vunpack.i.l.bf16 %v3149_v1  ;;  %v1979_v60 = vsel %vm1966_vm10, %v1962_v2, %v3135_v16  ;;  %v1980_v21 = vsel %vm1966_vm10, %v1963_v11, %v3136_v61 }
 0x137   : > { %v3144_v51 = vpop.permute.xlu0 %3143 }
 0x138   : > { %v3146_v37 = vunpack.i.h.bf16 %v3144_v51  ;;  %v3145_v27 = vunpack.i.l.bf16 %v3144_v51  ;;  %v1998_v13 = vsel %vm1983_vm11, %v1981_v52, %v3150_v28  ;;  %v1999_v42 = vsel %vm1983_vm11, %v1982_v22, %v3151_v58 }
 0x13a   : > { %v1996_v29 = vsel %vm1983_vm11, %v1979_v60, %v3145_v27  ;;  %v1997_v12 = vsel %vm1983_vm11, %v1980_v21, %v3146_v37 }
 0x13d   : > { %v3159_v9 = vpop.permute.xlu1 %3158 }
 0x13e   : > { %v3154_v14 = vpop.permute.xlu0 %3153  ;;  %v3161_v18 = vunpack.i.h.bf16 %v3159_v9  ;;  %v3160_v17 = vunpack.i.l.bf16 %v3159_v9 }
 0x13f   : > { %v3156_v19 = vunpack.i.h.bf16 %v3154_v14  ;;  %v3155_v48 = vunpack.i.l.bf16 %v3154_v14 }
 0x140   : > { %v2015_v25 = vsel %vm2000_vm12, %v1998_v13, %v3160_v17  ;;  %v2016_v34 = vsel %vm2000_vm12, %v1999_v42, %v3161_v18 }
 0x141   : > { %v3169_v47 = vpop.permute.xlu1 %3168  ;;  %v2013_v20 = vsel %vm2000_vm12, %v1996_v29, %v3155_v48  ;;  %v2014_v40 = vsel %vm2000_vm12, %v1997_v12, %v3156_v19 }
 0x142   : > { %v3171_v36 = vunpack.i.h.bf16 %v3169_v47  ;;  %v3170_v59 = vunpack.i.l.bf16 %v3169_v47  ;;  %v3164_v15 = vpop.permute.xlu0 %3163 }
 0x143   : > { %v3166_v57 = vunpack.i.h.bf16 %v3164_v15  ;;  %v3165_v32 = vunpack.i.l.bf16 %v3164_v15 }
 0x144   : > { %v2032_v7 = vsel %vm2017_vm13, %v2015_v25, %v3170_v59  ;;  %v2033_v33 = vsel %vm2017_vm13, %v2016_v34, %v3171_v36 }
 0x145   : > { %v2655_v49 = vpack.c.bf16 %v2033_v33, %v2032_v7  ;;  %v2030_v24 = vsel %vm2017_vm13, %v2013_v20, %v3165_v32  ;;  %v2031_v50 = vsel %vm2017_vm13, %v2014_v40, %v3166_v57 }
 0x146   : > { %v2652_v8 = vpack.c.bf16 %v2031_v50, %v2030_v24 }
 0x148   : > { %2783 = vmatprep.mubr.msk.bf16.mxu1 %vm4042_vm15, %v2652_v8 }
 0x149   : > { %2784 = vmatmul.mubr.msk.bf16.gmra.mrb[4].mxu1 %vm4042_vm15, %v2655_v49 }
 0x1b3   : > { %v2773_v30 = vpop.f32.mrb[0].mxu0 }
 0x1b4   : > { %v2157_v1 = vpop.f32.mrb[1].mxu0 }
 0x1b5   : > { %v2774_v44 = vpop.f32.mrb[2].mxu0 }
 0x1b6   : > { %v2700_v6 = vpack.c.bf16 %v2774_v44, %v2773_v30  ;;  %v2160_v41 = vpop.f32.mrb[3].mxu0 }
 0x1b7   : > { %v2695_v38 = vpack.c.bf16 %v2160_v41, %v2157_v1  ;;  %v2300_v43 = vadd.f32 %v2160_v41, %v2157_v1 }
 0x1b8   : > { %2732 = vst [vmem:[%s4214_s30 + $0x8] sm:$0xff] %v2700_v6  }
 0x1b9   : > { %2696 = vst [vmem:[%s4214_s30] sm:$0xff] %v2695_v38   ;;  %v2301_v51 = vadd.f32 %v2773_v30, %v2300_v43 }
 0x1bb   : > { %v2302_v39 = vadd.f32 %v2774_v44, %v2301_v51 }
 0x1c8   : > { %v2777_v54 = vpop.f32.mrb[4].mxu0 }
 0x1c9   : > { %v2173_v35 = vpop.f32.mrb[5].mxu0 }
 0x1ca   : > { %v2303_v56 = vadd.f32 %v2302_v39, %v2173_v35  ;;  %v2778_v10 = vpop.f32.mrb[6].mxu0 }
 0x1cb   : > { %v2710_v23 = vpack.c.bf16 %v2778_v10, %v2777_v54  ;;  %v2176_v46 = vpop.f32.mrb[7].mxu0 }
 0x1cc   : > { %v2705_v5 = vpack.c.bf16 %v2176_v46, %v2173_v35  ;;  %v2304_v4 = vadd.f32 %v2303_v56, %v2176_v46 }
 0x1cd   : > { %2734 = vst [vmem:[%s4214_s30 + $0x18] sm:$0xff] %v2710_v23  }
 0x1ce   : > { %2733 = vst [vmem:[%s4214_s30 + $0x10] sm:$0xff] %v2705_v5   ;;  %v2305_v31 = vadd.f32 %v2777_v54, %v2304_v4 }
 0x1d0   : > { %v2306_v62 = vadd.f32 %v2778_v10, %v2305_v31 }
 0x1f5   : > { %v2781_v55 = vpop.f32.mrb[0].mxu1 }
 0x1f6   : > { %v2189_v26 = vpop.f32.mrb[1].mxu1 }
 0x1f7   : > { %v2307_v3 = vadd.f32 %v2306_v62, %v2189_v26  ;;  %v2782_v0 = vpop.f32.mrb[2].mxu1 }
 0x1f8   : > { %v2720_v53 = vpack.c.bf16 %v2782_v0, %v2781_v55  ;;  %v2192_v61 = vpop.f32.mrb[3].mxu1 }
 0x1f9   : > { %v2715_v16 = vpack.c.bf16 %v2192_v61, %v2189_v26  ;;  %v2308_v58 = vadd.f32 %v2307_v3, %v2192_v61 }
 0x1fa   : > { %2736 = vst [vmem:[%s4214_s30 + $0x28] sm:$0xff] %v2720_v53  }
 0x1fb   : > { %2735 = vst [vmem:[%s4214_s30 + $0x20] sm:$0xff] %v2715_v16   ;;  %v2309_v28 = vadd.f32 %v2781_v55, %v2308_v58 }
 0x1fd   : > { %v2310_v9 = vadd.f32 %v2782_v0, %v2309_v28 }
 0x21c   : > { %v2785_v45 = vpop.f32.mrb[4].mxu1 }
 0x21d   : > { %v2205_v63 = vpop.f32.mrb[5].mxu1 }
 0x21e   : > { %v2311_v37 = vadd.f32 %v2310_v9, %v2205_v63  ;;  %v2786_v27 = vpop.f32.mrb[6].mxu1 }
 0x21f   : > { %v2730_v14 = vpack.c.bf16 %v2786_v27, %v2785_v45  ;;  %v2208_v2 = vpop.f32.mrb[7].mxu1 }
 0x220   : > { %v2725_v11 = vpack.c.bf16 %v2208_v2, %v2205_v63  ;;  %v2312_v18 = vadd.f32 %v2311_v37, %v2208_v2 }
 0x221   : > { %2738 = vst [vmem:[%s4214_s30 + $0x38] sm:$0xff] %v2730_v14  }
 0x222   : > { %2737 = vst [vmem:[%s4214_s30 + $0x30] sm:$0xff] %v2725_v11   ;;  %v2313_v17 = vadd.f32 %v2785_v45, %v2312_v18 }
 0x224   : > { %v2314_v52 = vadd.f32 %v2786_v27, %v2313_v17 }
 0x226   : > { %v2315_v22 = vrot.slane %v2314_v52, 4 }
 0x228   : > { %v2316_v19 = vadd.f32 %v2315_v22, %v2314_v52 }
 0x22a   : > { %v2317_v48 = vrot.slane %v2316_v19, 2 }
 0x22c   : > { %v2318_v60 = vadd.f32 %v2317_v48, %v2316_v19 }
 0x22e   : > { %v2319_v21 = vrot.slane %v2318_v60, 1 }
 0x230   : > { %v4224_v13 = vadd.f32 %v2319_v21, %v2318_v60 }
 0x232   : > { %v2321_v42 = vmul.f32 0.0078125, %v4224_v13 }
 0x234   : > { %v2322_v47 = vsub.f32 %v2157_v1, %v2321_v42  ;;  %v2323_v29 = vsub.f32 %v2160_v41, %v2321_v42  ;;  %v2324_v12 = vsub.f32 %v2773_v30, %v2321_v42  ;;  %v2325_v36 = vsub.f32 %v2774_v44, %v2321_v42 }
 0x235   : > { %v2326_v59 = vsub.f32 %v2173_v35, %v2321_v42  ;;  %v2327_v15 = vsub.f32 %v2176_v46, %v2321_v42  ;;  %v2328_v25 = vsub.f32 %v2777_v54, %v2321_v42  ;;  %v2329_v34 = vsub.f32 %v2778_v10, %v2321_v42 }
 0x236   : > { %v2330_v57 = vsub.f32 %v2189_v26, %v2321_v42  ;;  %v2331_v32 = vsub.f32 %v2192_v61, %v2321_v42  ;;  %v2332_v20 = vsub.f32 %v2781_v55, %v2321_v42  ;;  %v2333_v40 = vsub.f32 %v2782_v0, %v2321_v42 }
 0x237   : > { %v2334_v7 = vsub.f32 %v2205_v63, %v2321_v42  ;;  %v2335_v33 = vsub.f32 %v2208_v2, %v2321_v42  ;;  %v2336_v49 = vsub.f32 %v2785_v45, %v2321_v42  ;;  %v2337_v24 = vsub.f32 %v2786_v27, %v2321_v42 }
 0x238   : > { %v2338_v50 = vmul.f32 %v2322_v47, %v2322_v47  ;;  %v2339_v8 = vmul.f32 %v2323_v29, %v2323_v29  ;;  %v2340_v6 = vmul.f32 %v2324_v12, %v2324_v12  ;;  %v2341_v1 = vmul.f32 %v2325_v36, %v2325_v36 }
 0x239   : > { %v2342_v30 = vmul.f32 %v2326_v59, %v2326_v59  ;;  %v2343_v43 = vmul.f32 %v2327_v15, %v2327_v15  ;;  %v2344_v39 = vmul.f32 %v2328_v25, %v2328_v25  ;;  %v2345_v35 = vmul.f32 %v2329_v34, %v2329_v34 }
 0x23a   : > { %v2354_v38 = vadd.f32 %v2339_v8, %v2338_v50  ;;  %v2346_v10 = vmul.f32 %v2330_v57, %v2330_v57  ;;  %v2347_v46 = vmul.f32 %v2331_v32, %v2331_v32  ;;  %v2348_v4 = vmul.f32 %v2332_v20, %v2332_v20 }
 0x23b   : > { %v2349_v62 = vmul.f32 %v2333_v40, %v2333_v40  ;;  %v2350_v26 = vmul.f32 %v2334_v7, %v2334_v7  ;;  %v2351_v0 = vmul.f32 %v2335_v33, %v2335_v33  ;;  %v2352_v61 = vmul.f32 %v2336_v49, %v2336_v49 }
 0x23c   : > { %v2355_v41 = vadd.f32 %v2354_v38, %v2340_v6  ;;  %v2353_v58 = vmul.f32 %v2337_v24, %v2337_v24 }
 0x23e   : > { %v2356_v44 = vadd.f32 %v2355_v41, %v2341_v1 }
 0x240   : > { %v2357_v51 = vadd.f32 %v2356_v44, %v2342_v30 }
 0x242   : > { %v2358_v54 = vadd.f32 %v2357_v51, %v2343_v43 }
 0x244   : > { %v2359_v56 = vadd.f32 %v2358_v54, %v2344_v39 }
 0x246   : > { %v2360_v23 = vadd.f32 %v2359_v56, %v2345_v35 }
 0x248   : > { %v2361_v5 = vadd.f32 %v2360_v23, %v2346_v10 }
 0x24a   : > { %v2362_v31 = vadd.f32 %v2361_v5, %v2347_v46 }
 0x24c   : > { %v2363_v55 = vadd.f32 %v2362_v31, %v2348_v4 }
 0x24e   : > { %v2364_v3 = vadd.f32 %v2363_v55, %v2349_v62 }
 0x250   : > { %v2365_v53 = vadd.f32 %v2364_v3, %v2350_v26 }
 0x252   : > { %v2366_v16 = vadd.f32 %v2365_v53, %v2351_v0 }
 0x254   : > { %v2367_v28 = vadd.f32 %v2366_v16, %v2352_v61 }
 0x256   : > { %v2368_v9 = vadd.f32 %v2367_v28, %v2353_v58 }
 0x258   : > { %v2369_v45 = vrot.slane %v2368_v9, 4 }
 0x25a   : > { %v2370_v63 = vadd.f32 %v2369_v45, %v2368_v9 }
 0x25c   : > { %v2371_v37 = vrot.slane %v2370_v63, 2 }
 0x25e   : > { %v2372_v27 = vadd.f32 %v2371_v37, %v2370_v63 }
 0x260   : > { %v2373_v14 = vrot.slane %v2372_v27, 1 }
 0x262   : > { %v2374_v2 = vadd.f32 %v2373_v14, %v2372_v27 }
 0x264   : > { %v2376_v11 = vsel %vm2375_vm0, %v4224_v13, %v2374_v2 }
 0x265   : > { %2377 = vst [vmem:[%s214_s21] sm:$0x3] %v2376_v11 }
 0x266 PF: > { %s14_s16 = sadd.s32 1, %s3233_s16   ;;  %s4259_s12 = smov %s3225_s14 }
 0x267   : > { %p11_p8 = scmp.ge.s32.totalorder %s14_s16, 6   ;;  %s4260_s13 = smov %s3229_s15 }
 0x268   : > { %s4261_s14 = smov %s4264_s17  ;;  %s4262_s15 = smov %s4268_s18 }
 0x269   :  { %13 = sbr.rel (!%p11_p8) target bundleno = 3 (0x3), region = 73 }

</bundles_post_ra>
